<compile_context>
chip_gen: v6e
topology: v6e:2x2x1
jax: 0.10.0
libtpu: 0.0.40
codegen_flags: <defaults>
</compile_context>

<pallas_src>
import math
import functools

import jax
import jax.numpy as jnp
from jax import lax
from jax.experimental import pallas as pl
from jax.experimental.pallas import tpu as pltpu

EPS = 1e-5        # torch.nn.LayerNorm default eps
NEG_INF = -1e9    # matches masked_fill(-1000000000.0) in the torch reference


# ---------------------------------------------------------------------------
# in-kernel helpers (traced inside the Pallas kernel body)
# ---------------------------------------------------------------------------
def _layer_norm(x, gamma, beta):
    # LayerNorm over last dim, biased variance (matches torch.nn.LayerNorm), f32
    mean = jnp.mean(x, axis=-1, keepdims=True)
    var = jnp.mean(jnp.square(x - mean), axis=-1, keepdims=True)
    return (x - mean) * lax.rsqrt(var + EPS) * gamma + beta


def _softmax_pv(scores, v_bf, compute_dtype):
    """f32 biased scores -> stable softmax -> P @ V (V already in compute dtype)."""
    scores = scores - jnp.max(scores, axis=-1, keepdims=True)
    e = jnp.exp(scores)
    p = e * pl.reciprocal(jnp.sum(e, axis=-1, keepdims=True), approx=True)
    # TODO(synk): attention dropout omitted (inference / eval semantics)
    return lax.dot_general(p.astype(compute_dtype), v_bf,
                           (((2,), (1,)), ((0,), (0,))),
                           preferred_element_type=jnp.float32)       # (Bt, Sq, D)


# ---------------------------------------------------------------------------
# Pallas kernel: one decoder layer for one batch block; grid=(batch_blocks, N)
# The output block is revisited across the (innermost, "arbitrary") layer axis,
# so activations live in VMEM for the whole layer stack.
# ---------------------------------------------------------------------------
def decoder_fused_kernel(x_ref, mem_ref, tkb_ref, skb_ref,
                         wqk_ref, bqk_ref, w1_ref, b1_ref, ln_ref,
                         out_ref, *, d_k, compute_dtype):
    layer = pl.program_id(1)

    @pl.when(layer == 0)
    def _():
        out_ref[...] = x_ref[...]          # seed the VMEM-resident activations

    Bt, St, D = out_ref.shape
    Ss = mem_ref.shape[1]

    x3 = out_ref[...]                      # (Bt, St, D) f32, resident across layers
    mem_bf = mem_ref[...]                  # (Bt, Ss, D) already in compute_dtype

    # per-layer packed parameters (leading layer dim squeezed by the BlockSpec)
    w_self = wqk_ref[0]                    # (D, 2*d_k) = [Wq_self/sqrt(dk) | Wk_self], bf16
    w_src = wqk_ref[1]                     # (D, 2*d_k) = [Wq_src/sqrt(dk)  | Wk_src ], bf16
    b_self = bqk_ref[0:1, :]               # (1, 2*d_k) f32 (bq already scaled)
    b_src = bqk_ref[1:2, :]
    W1 = w1_ref[...]                       # (D, D) bf16
    b1 = b1_ref[0:1, :]                    # (1, D)  f32
    g1, be1 = ln_ref[0:1, :], ln_ref[1:2, :]
    g2, be2 = ln_ref[2:3, :], ln_ref[3:4, :]
    g3, be3 = ln_ref[4:5, :], ln_ref[5:6, :]

    # Causal additive bias generated in-kernel (cheap VPU iota work hidden under
    # the MXU) instead of DMAing an O(S^2) tensor from HBM every batch block.
    row = lax.broadcasted_iota(jnp.int32, (St, St), 0)
    col = lax.broadcasted_iota(jnp.int32, (St, St), 1)
    causal_bias = jnp.where(col <= row, 0.0, NEG_INF).astype(jnp.float32)

    # --- self-attention + residual, norm_1 ---------------------------------
    # Single bf16 cast of the resident slab, reused for the fused QK projection
    # input AND the (unprojected) value operand.
    x_bf = x3.reshape(Bt * St, D).astype(compute_dtype)
    qk = jnp.dot(x_bf, w_self, preferred_element_type=jnp.float32) + b_self   # (Bt*St, 2dk)
    q3 = qk[:, :d_k].reshape(Bt, St, d_k).astype(compute_dtype)
    k3 = qk[:, d_k:].reshape(Bt, St, d_k).astype(compute_dtype)
    scores = lax.dot_general(q3, k3, (((2,), (2,)), ((0,), (0,))),
                             preferred_element_type=jnp.float32)              # (Bt, St, St)
    scores = scores + causal_bias + tkb_ref[...]
    a = _softmax_pv(scores, x_bf.reshape(Bt, St, D), compute_dtype)
    x2 = _layer_norm((a + x3).reshape(Bt * St, D), g1, be1)
    x3 = x2.reshape(Bt, St, D)

    # --- src-attention over memory + residual, norm_2 -----------------------
    x_bf = x2.astype(compute_dtype)                              # post-norm_1 query input
    q2 = jnp.dot(x_bf, w_src[:, :d_k],
                 preferred_element_type=jnp.float32) + b_src[:, :d_k]
    k2 = jnp.dot(mem_bf.reshape(Bt * Ss, D), w_src[:, d_k:],
                 preferred_element_type=jnp.float32) + b_src[:, d_k:]
    q3 = q2.reshape(Bt, St, d_k).astype(compute_dtype)
    k3 = k2.reshape(Bt, Ss, d_k).astype(compute_dtype)
    scores = lax.dot_general(q3, k3, (((2,), (2,)), ((0,), (0,))),
                             preferred_element_type=jnp.float32)              # (Bt, St, Ss)
    scores = scores + skb_ref[...]
    a = _softmax_pv(scores, mem_bf, compute_dtype)
    x2 = _layer_norm((a + x3).reshape(Bt * St, D), g2, be2)

    # --- positionwise feed-forward + residual, norm_3 (flattened slab) ------
    # TODO(synk): feed-forward dropout omitted (inference / eval semantics)
    h = jnp.dot(x2.astype(compute_dtype), W1, preferred_element_type=jnp.float32) + b1
    x2 = _layer_norm(jnp.maximum(h, 0.0) + x2, g3, be3)

    out_ref[...] = x2.reshape(Bt, St, D).astype(out_ref.dtype)


# ---------------------------------------------------------------------------
# one-time offline parameter preparation for the kernel
# ---------------------------------------------------------------------------
def prepare_decoder_params(params, d_k, compute_dtype=jnp.bfloat16):
    """Fold 1/sqrt(d_k) into Wq/bq, pack [Wq|Wk] along the output dim (fused
    self-attn QK projection), and cast the matmul weights to bf16 ONCE."""
    wqk, bqk, w1, b1, ln = params
    assert wqk.shape[1] == 4 and wqk.shape[-1] == d_k
    scale = 1.0 / math.sqrt(d_k)
    w_self = jnp.concatenate([wqk[:, 0] * scale, wqk[:, 1]], axis=-1)   # (N, D, 2dk)
    w_src = jnp.concatenate([wqk[:, 2] * scale, wqk[:, 3]], axis=-1)    # (N, D, 2dk)
    w_pack = jnp.stack([w_self, w_src], axis=1).astype(compute_dtype)   # (N, 2, D, 2dk)
    b_self = jnp.concatenate([bqk[:, 0] * scale, bqk[:, 1]], axis=-1)   # (N, 2dk)
    b_src = jnp.concatenate([bqk[:, 2] * scale, bqk[:, 3]], axis=-1)
    b_pack = jnp.stack([b_self, b_src], axis=1).astype(jnp.float32)     # (N, 2, 2dk)
    return (w_pack, b_pack, w1.astype(compute_dtype),
            b1.astype(jnp.float32), ln.astype(jnp.float32))


# ---------------------------------------------------------------------------
# wrapper: a single fused pallas_call over all N layers
# ---------------------------------------------------------------------------
def decoder_forward_pallas(x, memory, src_key_mask, prepared_params, d_k, *,
                           tgt_key_mask=None, batch_block=None,
                           compute_dtype=jnp.bfloat16):
    B, St, D = x.shape
    Ss = memory.shape[1]
    w_pack, b_pack, w1, b1, ln = prepared_params
    num_layers = w_pack.shape[0]
    assert w_pack.shape[-1] == 2 * d_k

    if batch_block is None:
        # v7x has 2 TensorCores: keep >= 2 blocks on the "parallel" batch axis
        # whenever possible (grow batch_block, subject to the VMEM budget below,
        # to fatten the Bt*St matmul M dimension on bigger batches).
        batch_block = B // 2 if (B >= 2 and B % 2 == 0) else B
    assert B % batch_block == 0, "batch must be divisible by batch_block"
    Bt = batch_block

    # Key-padding masks become tiny (B,1,S) additive biases reused by every
    # layer; the causal target structure is generated in-kernel, so no
    # O(B*S^2) bias tensors are ever materialized in HBM.
    if tgt_key_mask is None:
        tgt_key_mask = jnp.ones((B, St), jnp.float32)
    tgt_kbias = jnp.where(tgt_key_mask.reshape(B, 1, St) == 0, NEG_INF, 0.0).astype(jnp.float32)
    src_kbias = jnp.where(src_key_mask.reshape(B, 1, Ss) == 0, NEG_INF, 0.0).astype(jnp.float32)

    # memory is only ever consumed as a bf16 matmul operand (K-projection input
    # and the unprojected V) -> ship it to the kernel in bf16.
    mem_bf = memory.astype(compute_dtype)

    # Explicit scoped-VMEM budget (defaults are only 16/32 MiB): double-buffered
    # blocks + headroom for in-kernel temporaries (scores / probs / activations).
    bytes_f32 = 4 * (2 * Bt * St * D                  # x seed block + resident out block
                     + Bt * St + Bt * Ss              # key biases
                     + 2 * 2 * d_k + 7 * D)           # small f32 params (bqk, b1, ln)
    bytes_bf16 = 2 * (Bt * Ss * D                     # memory block
                      + 2 * D * 2 * d_k + D * D)      # packed bf16 weights
    block_bytes = 2 * (bytes_f32 + bytes_bf16)        # double buffering
    scratch_bytes = 4 * (3 * Bt * St * max(St, Ss) + 6 * Bt * St * D)
    vmem_limit = min(100 * 1024 * 1024,
                     max(32 * 1024 * 1024, 2 * (block_bytes + scratch_bytes)))

    kernel = functools.partial(decoder_fused_kernel, d_k=d_k,
                               compute_dtype=compute_dtype)

    # TODO(synk): for long sequences (esp. v7x 64 MiB VMEM) the (St,St)/(St,Ss)
    # score tiles need flash-style key tiling; fine at these demo shapes.
    # TODO(synk): once verified on the target jax version, mark the four
    # layer-invariant inputs below with pipeline_mode=pl.Buffered(1) to drop the
    # dead second pipeline buffer (per-layer weight specs keep the default 2).
    return pl.pallas_call(
        kernel,
        out_shape=jax.ShapeDtypeStruct((B, St, D), jnp.float32),
        grid_spec=pltpu.PrefetchScalarGridSpec(
            num_scalar_prefetch=0,
            grid=(B // Bt, num_layers),                   # (batch blocks, layers)
            in_specs=[
                pl.BlockSpec((Bt, St, D), lambda b, l: (b, 0, 0)),   # x (layer-0 seed, f32)
                pl.BlockSpec((Bt, Ss, D), lambda b, l: (b, 0, 0)),   # memory (bf16)
                pl.BlockSpec((Bt, 1, St), lambda b, l: (b, 0, 0)),   # tgt key bias (B,1,St)
                pl.BlockSpec((Bt, 1, Ss), lambda b, l: (b, 0, 0)),   # src key bias (B,1,Ss)
                pl.BlockSpec((None, 2, D, 2 * d_k), lambda b, l: (l, 0, 0, 0)),  # fused Wq|Wk
                pl.BlockSpec((None, 2, 2 * d_k), lambda b, l: (l, 0, 0)),        # q/k biases
                pl.BlockSpec((None, D, D), lambda b, l: (l, 0, 0)),              # FFN weight
                pl.BlockSpec((None, 1, D), lambda b, l: (l, 0, 0)),              # FFN bias
                pl.BlockSpec((None, 6, D), lambda b, l: (l, 0, 0)),              # LN params
            ],
            # Same batch block for every layer -> activations stay in VMEM
            # across the whole layer stack (accumulator-resident output).
            out_specs=pl.BlockSpec((Bt, St, D), lambda b, l: (b, 0, 0)),
        ),
        compiler_params=pltpu.CompilerParams(
            dimension_semantics=("parallel", "arbitrary"),
            vmem_limit_bytes=int(vmem_limit)),
    )(x, mem_bf, tgt_kbias, src_kbias, w_pack, b_pack, w1, b1, ln)


# ---------------------------------------------------------------------------
# deterministic parameter init (shapes follow Decoder.__init__), layer-stacked
# ---------------------------------------------------------------------------
def init_decoder_params(key, N, d_model, d_k):
    k0, k1, k2, k3 = jax.random.split(key, 4)
    # rows (axis=1): [Wq_self, Wk_self, Wq_src, Wk_src]
    wqk = 0.1 * jax.random.normal(k0, (N, 4, d_model, d_k), jnp.float32)
    bqk = 0.1 * jax.random.normal(k1, (N, 4, d_k), jnp.float32)
    w1 = 0.1 * jax.random.normal(k2, (N, d_model, d_model), jnp.float32)
    b1 = 0.1 * jax.random.normal(k3, (N, 1, d_model), jnp.float32)
    # rows: [g1, beta1, g2, beta2, g3, beta3] — torch LayerNorm default init
    ln_one = jnp.stack([jnp.ones(d_model), jnp.zeros(d_model)] * 3)
    ln = jnp.tile(ln_one[None], (N, 1, 1)).astype(jnp.float32)
    return (wqk, bqk, w1, b1, ln)


# ---------------------------------------------------------------------------
# pure-JAX f32 reference (mirrors the torch forward, eval mode) for validation
# ---------------------------------------------------------------------------
def _ref_attention(xq, kv, mask, Wq, bq, Wk, bk, d_k):
    q = xq @ Wq + bq
    k = kv @ Wk + bk
    scores = jnp.einsum("bqd,bkd->bqk", q, k) / math.sqrt(d_k)
    scores = jnp.where(mask == 0, NEG_INF, scores)
    p = jax.nn.softmax(scores, axis=-1)
    return jnp.einsum("bqk,bkd->bqd", p, kv)


def _ref_ln(x, g, b):
    mean = jnp.mean(x, axis=-1, keepdims=True)
    var = jnp.mean((x - mean) ** 2, axis=-1, keepdims=True)
    return (x - mean) / jnp.sqrt(var + EPS) * g + b


def decoder_forward_ref(x, memory, src_mask, tgt_mask, params, d_k):
    wqk, bqk, w1, b1, ln = params
    for i in range(wqk.shape[0]):
        x = _ref_attention(x, x, tgt_mask,
                           wqk[i, 0], bqk[i, 0], wqk[i, 1], bqk[i, 1], d_k) + x
        x = _ref_ln(x, ln[i, 0], ln[i, 1])
        x = _ref_attention(x, memory, src_mask,
                           wqk[i, 2], bqk[i, 2], wqk[i, 3], bqk[i, 3], d_k) + x
        x = _ref_ln(x, ln[i, 2], ln[i, 3])
        x = _ref_ln(jnp.maximum(x @ w1[i] + b1[i, 0], 0.0) + x, ln[i, 4], ln[i, 5])
    return x


# ---------------------------------------------------------------------------
if __name__ == "__main__":
    N = 2          # number of decoder layers
    B = 2          # batch
    S_TGT = 8      # target sequence length (multiple of 8 sublanes)
    S_SRC = 8      # source sequence length
    D = 128        # d_model — lane-dense (D % 128 == 0): unmasked stores, no-op reshapes
    D_K = 64       # d_k — fused self-attn QK projection width = 2*d_k = 128 lanes

    key = jax.random.PRNGKey(0)
    kx, km, kp = jax.random.split(key, 3)

    x = jax.random.normal(kx, (B, S_TGT, D), jnp.float32)
    memory = jax.random.normal(km, (B, S_SRC, D), jnp.float32)

    # source key-padding mask: batch 0 attends everywhere, batch 1 has last 2
    # source positions masked (1 = keep, 0 = masked)
    src_key_mask = jnp.stack([
        jnp.ones((S_SRC,), jnp.float32),
        jnp.concatenate([jnp.ones((S_SRC - 2,), jnp.float32),
                         jnp.zeros((2,), jnp.float32)])])

    params = init_decoder_params(kp, N, D, D_K)
    prepared = prepare_decoder_params(params, D_K, compute_dtype=jnp.bfloat16)

    out = decoder_forward_pallas(x, memory, src_key_mask, prepared, D_K)
    out = jax.block_until_ready(out)

    # reference uses the equivalent explicit full masks (causal tgt + key-padding src)
    tgt_mask = jnp.broadcast_to(jnp.tril(jnp.ones((S_TGT, S_TGT), jnp.float32)),
                                (B, S_TGT, S_TGT))
    src_mask = jnp.broadcast_to(src_key_mask[:, None, :], (B, S_TGT, S_SRC))
    ref = decoder_forward_ref(x, memory, src_mask, tgt_mask, params, D_K)

    assert out.shape == (B, S_TGT, D)
    # bf16 MXU operands (incl. a D=128 contraction FFN) + approx reciprocal ->
    # compare to the f32 reference with a correspondingly relaxed tolerance.
    assert jnp.allclose(out, ref, atol=7.5e-2, rtol=5e-2), \
        "Pallas output mismatch vs reference"

    print("KERNEL_OK")
</pallas_src>

<mosaic_0001>
module attributes {stable_mosaic.version = 11 : i64} {
  func.func @decoder_fused_kernel(%arg0: i32, %arg1: i32, %arg2: memref<1x8x128xf32, #tpu.memory_space<vmem>>, %arg3: memref<1x8x128xbf16, #tpu.memory_space<vmem>>, %arg4: memref<1x1x8xf32, #tpu.memory_space<vmem>>, %arg5: memref<1x1x8xf32, #tpu.memory_space<vmem>>, %arg6: memref<1x2x128x128xbf16, #tpu.memory_space<vmem>>, %arg7: memref<1x2x128xf32, #tpu.memory_space<vmem>>, %arg8: memref<1x128x128xbf16, #tpu.memory_space<vmem>>, %arg9: memref<1x1x128xf32, #tpu.memory_space<vmem>>, %arg10: memref<1x6x128xf32, #tpu.memory_space<vmem>>, %arg11: memref<1x8x128xf32, #tpu.memory_space<vmem>>) attributes {dimension_semantics = [#tpu.dimension_semantics<parallel>, #tpu.dimension_semantics<arbitrary>], iteration_bounds = array<i64: 2, 2>, scalar_prefetch = 0 : i64, scratch_operands = 0 : i64, tpu.core_type = #tpu.core_type<tc>, window_params = [{transform_indices = @transform_0, window_bounds = array<i64: 1, 8, 128>}, {transform_indices = @transform_1, window_bounds = array<i64: 1, 8, 128>}, {transform_indices = @transform_2, window_bounds = array<i64: 1, 1, 8>}, {transform_indices = @transform_3, window_bounds = array<i64: 1, 1, 8>}, {transform_indices = @transform_4, window_bounds = array<i64: 1, 2, 128, 128>}, {transform_indices = @transform_5, window_bounds = array<i64: 1, 2, 128>}, {transform_indices = @transform_6, window_bounds = array<i64: 1, 128, 128>}, {transform_indices = @transform_7, window_bounds = array<i64: 1, 1, 128>}, {transform_indices = @transform_8, window_bounds = array<i64: 1, 6, 128>}, {transform_indices = @transform_9, window_bounds = array<i64: 1, 8, 128>}]} {
    %c0_i32 = arith.constant 0 : i32
    %0 = arith.cmpi eq, %arg1, %c0_i32 : i32
    %1 = arith.extui %0 : i1 to i32
    %c0_i32_0 = arith.constant 0 : i32
    %2 = arith.cmpi ne, %1, %c0_i32_0 : i32
    scf.if %2 {
      %c0_77 = arith.constant 0 : index
      %c0_78 = arith.constant 0 : index
      %c0_79 = arith.constant 0 : index
      %177 = vector.load %arg2[%c0_77, %c0_78, %c0_79] : memref<1x8x128xf32, #tpu.memory_space<vmem>>, vector<1x8x128xf32>
      %c0_80 = arith.constant 0 : index
      %c0_81 = arith.constant 0 : index
      %c0_82 = arith.constant 0 : index
      %178 = vector.load %arg11[%c0_80, %c0_81, %c0_82] : memref<1x8x128xf32, #tpu.memory_space<vmem>>, vector<1x8x128xf32>
      tpu.vector_store %arg11[%c0_80, %c0_81, %c0_82], %177 {strides = array<i32>} : memref<1x8x128xf32, #tpu.memory_space<vmem>>, vector<1x8x128xf32>,
    } else {
    }
    %c0 = arith.constant 0 : index
    %c0_1 = arith.constant 0 : index
    %c0_2 = arith.constant 0 : index
    %3 = vector.load %arg11[%c0, %c0_1, %c0_2] : memref<1x8x128xf32, #tpu.memory_space<vmem>>, vector<1x8x128xf32>
    %c0_3 = arith.constant 0 : index
    %c0_4 = arith.constant 0 : index
    %c0_5 = arith.constant 0 : index
    %4 = vector.load %arg3[%c0_3, %c0_4, %c0_5] : memref<1x8x128xbf16, #tpu.memory_space<vmem>>, vector<1x8x128xbf16>
    %c0_6 = arith.constant 0 : index
    %c0_7 = arith.constant 0 : index
    %c0_8 = arith.constant 0 : index
    %c0_9 = arith.constant 0 : index
    %5 = vector.load %arg6[%c0_6, %c0_7, %c0_8, %c0_9] : memref<1x2x128x128xbf16, #tpu.memory_space<vmem>>, vector<1x1x128x128xbf16>
    %6 = vector.shape_cast %5 : vector<1x1x128x128xbf16> to vector<128x128xbf16>
    %c0_10 = arith.constant 0 : index
    %c1 = arith.constant 1 : index
    %c0_11 = arith.constant 0 : index
    %c0_12 = arith.constant 0 : index
    %7 = vector.load %arg6[%c0_10, %c1, %c0_11, %c0_12] : memref<1x2x128x128xbf16, #tpu.memory_space<vmem>>, vector<1x1x128x128xbf16>
    %8 = vector.shape_cast %7 : vector<1x1x128x128xbf16> to vector<128x128xbf16>
    %c0_13 = arith.constant 0 : index
    %c0_14 = arith.constant 0 : index
    %c0_15 = arith.constant 0 : index
    %9 = vector.load %arg7[%c0_13, %c0_14, %c0_15] : memref<1x2x128xf32, #tpu.memory_space<vmem>>, vector<1x1x128xf32>
    %10 = vector.shape_cast %9 : vector<1x1x128xf32> to vector<1x128xf32>
    %c0_16 = arith.constant 0 : index
    %c1_17 = arith.constant 1 : index
    %c0_18 = arith.constant 0 : index
    %11 = vector.load %arg7[%c0_16, %c1_17, %c0_18] : memref<1x2x128xf32, #tpu.memory_space<vmem>>, vector<1x1x128xf32>
    %12 = vector.shape_cast %11 : vector<1x1x128xf32> to vector<1x128xf32>
    %c0_19 = arith.constant 0 : index
    %c0_20 = arith.constant 0 : index
    %c0_21 = arith.constant 0 : index
    %13 = vector.load %arg8[%c0_19, %c0_20, %c0_21] : memref<1x128x128xbf16, #tpu.memory_space<vmem>>, vector<1x128x128xbf16>
    %14 = vector.shape_cast %13 : vector<1x128x128xbf16> to vector<128x128xbf16>
    %c0_22 = arith.constant 0 : index
    %c0_23 = arith.constant 0 : index
    %c0_24 = arith.constant 0 : index
    %15 = vector.load %arg9[%c0_22, %c0_23, %c0_24] : memref<1x1x128xf32, #tpu.memory_space<vmem>>, vector<1x1x128xf32>
    %16 = vector.shape_cast %15 : vector<1x1x128xf32> to vector<1x128xf32>
    %c0_25 = arith.constant 0 : index
    %c0_26 = arith.constant 0 : index
    %c0_27 = arith.constant 0 : index
    %17 = vector.load %arg10[%c0_25, %c0_26, %c0_27] : memref<1x6x128xf32, #tpu.memory_space<vmem>>, vector<1x1x128xf32>
    %18 = vector.shape_cast %17 : vector<1x1x128xf32> to vector<1x128xf32>
    %c0_28 = arith.constant 0 : index
    %c1_29 = arith.constant 1 : index
    %c0_30 = arith.constant 0 : index
    %19 = vector.load %arg10[%c0_28, %c1_29, %c0_30] : memref<1x6x128xf32, #tpu.memory_space<vmem>>, vector<1x1x128xf32>
    %20 = vector.shape_cast %19 : vector<1x1x128xf32> to vector<1x128xf32>
    %c0_31 = arith.constant 0 : index
    %c2 = arith.constant 2 : index
    %c0_32 = arith.constant 0 : index
    %21 = vector.load %arg10[%c0_31, %c2, %c0_32] : memref<1x6x128xf32, #tpu.memory_space<vmem>>, vector<1x1x128xf32>
    %22 = vector.shape_cast %21 : vector<1x1x128xf32> to vector<1x128xf32>
    %c0_33 = arith.constant 0 : index
    %c3 = arith.constant 3 : index
    %c0_34 = arith.constant 0 : index
    %23 = vector.load %arg10[%c0_33, %c3, %c0_34] : memref<1x6x128xf32, #tpu.memory_space<vmem>>, vector<1x1x128xf32>
    %24 = vector.shape_cast %23 : vector<1x1x128xf32> to vector<1x128xf32>
    %c0_35 = arith.constant 0 : index
    %c4 = arith.constant 4 : index
    %c0_36 = arith.constant 0 : index
    %25 = vector.load %arg10[%c0_35, %c4, %c0_36] : memref<1x6x128xf32, #tpu.memory_space<vmem>>, vector<1x1x128xf32>
    %26 = vector.shape_cast %25 : vector<1x1x128xf32> to vector<1x128xf32>
    %c0_37 = arith.constant 0 : index
    %c5 = arith.constant 5 : index
    %c0_38 = arith.constant 0 : index
    %27 = vector.load %arg10[%c0_37, %c5, %c0_38] : memref<1x6x128xf32, #tpu.memory_space<vmem>>, vector<1x1x128xf32>
    %28 = vector.shape_cast %27 : vector<1x1x128xf32> to vector<1x128xf32>
    %29 = tpu.iota {dimensions = array<i32: 0>} : vector<8x8xi32>
    %30 = tpu.iota {dimensions = array<i32: 1>} : vector<8x8xi32>
    %31 = arith.cmpi sle, %30, %29 : vector<8x8xi32>
    %cst = arith.constant 0.000000e+00 : f32
    %cst_39 = arith.constant -1.000000e+09 : f32
    %32 = vector.broadcast %cst : f32 to vector<8x8xf32>
    %33 = vector.broadcast %cst_39 : f32 to vector<8x8xf32>
    %34 = arith.select %31, %32, %33 : vector<8x8xi1>, vector<8x8xf32>
    %35 = vector.shape_cast %3 : vector<1x8x128xf32> to vector<8x128xf32>
    %36 = arith.truncf %35 : vector<8x128xf32> to vector<8x128xbf16>
    %cst_40 = arith.constant dense<0.000000e+00> : vector<8x128xf32>
    %37 = tpu.matmul %36, %6, %cst_40 {dimension_numbers = #tpu.dot_dimension_numbers<[1], [0], [0], [1], [0, 0, 1, 1], [], []>} : vector<8x128xbf16>, vector<128x128xbf16>, vector<8x128xf32> -> vector<8x128xf32>
    %38 = vector.broadcast %10 : vector<1x128xf32> to vector<8x128xf32>
    %39 = arith.addf %37, %38 : vector<8x128xf32>
    %40 = vector.extract_strided_slice %39 {offsets = [0, 0], sizes = [8, 64], strides = [1, 1]} : vector<8x128xf32> to vector<8x64xf32>
    %41 = vector.shape_cast %40 : vector<8x64xf32> to vector<1x8x64xf32>
    %42 = arith.truncf %41 : vector<1x8x64xf32> to vector<1x8x64xbf16>
    %43 = vector.extract_strided_slice %39 {offsets = [0, 64], sizes = [8, 64], strides = [1, 1]} : vector<8x128xf32> to vector<8x64xf32>
    %44 = vector.shape_cast %43 : vector<8x64xf32> to vector<1x8x64xf32>
    %45 = arith.truncf %44 : vector<1x8x64xf32> to vector<1x8x64xbf16>
    %cst_41 = arith.constant dense<0.000000e+00> : vector<1x8x8xf32>
    %46 = tpu.matmul %42, %45, %cst_41 {dimension_numbers = #tpu.dot_dimension_numbers<[2], [2], [1], [1], [0, 0, 0, 1, 1, 1], [0], [0]>} : vector<1x8x64xbf16>, vector<1x8x64xbf16>, vector<1x8x8xf32> -> vector<1x8x8xf32>
    %47 = vector.shape_cast %34 : vector<8x8xf32> to vector<1x8x8xf32>
    %48 = arith.addf %46, %47 : vector<1x8x8xf32>
    %c0_42 = arith.constant 0 : index
    %c0_43 = arith.constant 0 : index
    %c0_44 = arith.constant 0 : index
    %49 = vector.load %arg4[%c0_42, %c0_43, %c0_44] : memref<1x1x8xf32, #tpu.memory_space<vmem>>, vector<1x1x8xf32>
    %50 = vector.broadcast %49 : vector<1x1x8xf32> to vector<1x8x8xf32>
    %51 = arith.addf %48, %50 : vector<1x8x8xf32>
    %52 = vector.shape_cast %36 : vector<8x128xbf16> to vector<1x8x128xbf16>
    %cst_45 = arith.constant dense<0xFF800000> : vector<1x8xf32>
    %53 = vector.multi_reduction <maximumf>, %51, %cst_45 [2] : vector<1x8x8xf32> to vector<1x8xf32>
    %54 = vector.shape_cast %53 : vector<1x8xf32> to vector<1x8x1xf32>
    %55 = vector.broadcast %54 : vector<1x8x1xf32> to vector<1x8x8xf32>
    %56 = arith.subf %51, %55 : vector<1x8x8xf32>
    %57 = math.exp %56 : vector<1x8x8xf32>
    %cst_46 = arith.constant dense<0.000000e+00> : vector<1x8xf32>
    %58 = vector.multi_reduction <add>, %57, %cst_46 [2] : vector<1x8x8xf32> to vector<1x8xf32>
    %59 = vector.shape_cast %58 : vector<1x8xf32> to vector<1x8x1xf32>
    %60 = tpu.reciprocal %59 {approx = true} : vector<1x8x1xf32> -> vector<1x8x1xf32>
    %61 = vector.broadcast %60 : vector<1x8x1xf32> to vector<1x8x8xf32>
    %62 = arith.mulf %57, %61 : vector<1x8x8xf32>
    %63 = arith.truncf %62 : vector<1x8x8xf32> to vector<1x8x8xbf16>
    %cst_47 = arith.constant dense<0.000000e+00> : vector<1x8x128xf32>
    %64 = tpu.matmul %63, %52, %cst_47 {dimension_numbers = #tpu.dot_dimension_numbers<[2], [1], [1], [2], [0, 0, 0, 1, 1, 2], [0], [0]>} : vector<1x8x8xbf16>, vector<1x8x128xbf16>, vector<1x8x128xf32> -> vector<1x8x128xf32>
    %65 = arith.addf %64, %3 : vector<1x8x128xf32>
    %66 = vector.shape_cast %65 : vector<1x8x128xf32> to vector<8x128xf32>
    %cst_48 = arith.constant dense<0.000000e+00> : vector<8xf32>
    %67 = vector.multi_reduction <add>, %66, %cst_48 [1] : vector<8x128xf32> to vector<8xf32>
    %68 = vector.shape_cast %67 : vector<8xf32> to vector<8x1xf32>
    %cst_49 = arith.constant 1.280000e+02 : f32
    %69 = vector.broadcast %cst_49 : f32 to vector<8x1xf32>
    %70 = arith.divf %68, %69 : vector<8x1xf32>
    %71 = vector.broadcast %70 : vector<8x1xf32> to vector<8x128xf32>
    %72 = arith.subf %66, %71 : vector<8x128xf32>
    %73 = arith.mulf %72, %72 : vector<8x128xf32>
    %cst_50 = arith.constant dense<0.000000e+00> : vector<8xf32>
    %74 = vector.multi_reduction <add>, %73, %cst_50 [1] : vector<8x128xf32> to vector<8xf32>
    %75 = vector.shape_cast %74 : vector<8xf32> to vector<8x1xf32>
    %cst_51 = arith.constant 1.280000e+02 : f32
    %76 = vector.broadcast %cst_51 : f32 to vector<8x1xf32>
    %77 = arith.divf %75, %76 : vector<8x1xf32>
    %78 = vector.broadcast %70 : vector<8x1xf32> to vector<8x128xf32>
    %79 = arith.subf %66, %78 : vector<8x128xf32>
    %cst_52 = arith.constant 9.99999974E-6 : f32
    %80 = vector.broadcast %cst_52 : f32 to vector<8x1xf32>
    %81 = arith.addf %77, %80 : vector<8x1xf32>
    %82 = math.rsqrt %81 : vector<8x1xf32>
    %83 = vector.broadcast %82 : vector<8x1xf32> to vector<8x128xf32>
    %84 = arith.mulf %79, %83 : vector<8x128xf32>
    %85 = vector.broadcast %18 : vector<1x128xf32> to vector<8x128xf32>
    %86 = arith.mulf %84, %85 : vector<8x128xf32>
    %87 = vector.broadcast %20 : vector<1x128xf32> to vector<8x128xf32>
    %88 = arith.addf %86, %87 : vector<8x128xf32>
    %89 = vector.shape_cast %88 : vector<8x128xf32> to vector<1x8x128xf32>
    %90 = arith.truncf %88 : vector<8x128xf32> to vector<8x128xbf16>
    %91 = vector.extract_strided_slice %8 {offsets = [0, 0], sizes = [128, 64], strides = [1, 1]} : vector<128x128xbf16> to vector<128x64xbf16>
    %cst_53 = arith.constant dense<0.000000e+00> : vector<8x64xf32>
    %92 = tpu.matmul %90, %91, %cst_53 {dimension_numbers = #tpu.dot_dimension_numbers<[1], [0], [0], [1], [0, 0, 1, 1], [], []>} : vector<8x128xbf16>, vector<128x64xbf16>, vector<8x64xf32> -> vector<8x64xf32>
    %93 = vector.extract_strided_slice %12 {offsets = [0, 0], sizes = [1, 64], strides = [1, 1]} : vector<1x128xf32> to vector<1x64xf32>
    %94 = vector.broadcast %93 : vector<1x64xf32> to vector<8x64xf32>
    %95 = arith.addf %92, %94 : vector<8x64xf32>
    %96 = vector.shape_cast %4 : vector<1x8x128xbf16> to vector<8x128xbf16>
    %97 = vector.extract_strided_slice %8 {offsets = [0, 64], sizes = [128, 64], strides = [1, 1]} : vector<128x128xbf16> to vector<128x64xbf16>
    %cst_54 = arith.constant dense<0.000000e+00> : vector<8x64xf32>
    %98 = tpu.matmul %96, %97, %cst_54 {dimension_numbers = #tpu.dot_dimension_numbers<[1], [0], [0], [1], [0, 0, 1, 1], [], []>} : vector<8x128xbf16>, vector<128x64xbf16>, vector<8x64xf32> -> vector<8x64xf32>
    %99 = vector.extract_strided_slice %12 {offsets = [0, 64], sizes = [1, 64], strides = [1, 1]} : vector<1x128xf32> to vector<1x64xf32>
    %100 = vector.broadcast %99 : vector<1x64xf32> to vector<8x64xf32>
    %101 = arith.addf %98, %100 : vector<8x64xf32>
    %102 = vector.shape_cast %95 : vector<8x64xf32> to vector<1x8x64xf32>
    %103 = arith.truncf %102 : vector<1x8x64xf32> to vector<1x8x64xbf16>
    %104 = vector.shape_cast %101 : vector<8x64xf32> to vector<1x8x64xf32>
    %105 = arith.truncf %104 : vector<1x8x64xf32> to vector<1x8x64xbf16>
    %cst_55 = arith.constant dense<0.000000e+00> : vector<1x8x8xf32>
    %106 = tpu.matmul %103, %105, %cst_55 {dimension_numbers = #tpu.dot_dimension_numbers<[2], [2], [1], [1], [0, 0, 0, 1, 1, 1], [0], [0]>} : vector<1x8x64xbf16>, vector<1x8x64xbf16>, vector<1x8x8xf32> -> vector<1x8x8xf32>
    %c0_56 = arith.constant 0 : index
    %c0_57 = arith.constant 0 : index
    %c0_58 = arith.constant 0 : index
    %107 = vector.load %arg5[%c0_56, %c0_57, %c0_58] : memref<1x1x8xf32, #tpu.memory_space<vmem>>, vector<1x1x8xf32>
    %108 = vector.broadcast %107 : vector<1x1x8xf32> to vector<1x8x8xf32>
    %109 = arith.addf %106, %108 : vector<1x8x8xf32>
    %cst_59 = arith.constant dense<0xFF800000> : vector<1x8xf32>
    %110 = vector.multi_reduction <maximumf>, %109, %cst_59 [2] : vector<1x8x8xf32> to vector<1x8xf32>
    %111 = vector.shape_cast %110 : vector<1x8xf32> to vector<1x8x1xf32>
    %112 = vector.broadcast %111 : vector<1x8x1xf32> to vector<1x8x8xf32>
    %113 = arith.subf %109, %112 : vector<1x8x8xf32>
    %114 = math.exp %113 : vector<1x8x8xf32>
    %cst_60 = arith.constant dense<0.000000e+00> : vector<1x8xf32>
    %115 = vector.multi_reduction <add>, %114, %cst_60 [2] : vector<1x8x8xf32> to vector<1x8xf32>
    %116 = vector.shape_cast %115 : vector<1x8xf32> to vector<1x8x1xf32>
    %117 = tpu.reciprocal %116 {approx = true} : vector<1x8x1xf32> -> vector<1x8x1xf32>
    %118 = vector.broadcast %117 : vector<1x8x1xf32> to vector<1x8x8xf32>
    %119 = arith.mulf %114, %118 : vector<1x8x8xf32>
    %120 = arith.truncf %119 : vector<1x8x8xf32> to vector<1x8x8xbf16>
    %cst_61 = arith.constant dense<0.000000e+00> : vector<1x8x128xf32>
    %121 = tpu.matmul %120, %4, %cst_61 {dimension_numbers = #tpu.dot_dimension_numbers<[2], [1], [1], [2], [0, 0, 0, 1, 1, 2], [0], [0]>} : vector<1x8x8xbf16>, vector<1x8x128xbf16>, vector<1x8x128xf32> -> vector<1x8x128xf32>
    %122 = arith.addf %121, %89 : vector<1x8x128xf32>
    %123 = vector.shape_cast %122 : vector<1x8x128xf32> to vector<8x128xf32>
    %cst_62 = arith.constant dense<0.000000e+00> : vector<8xf32>
    %124 = vector.multi_reduction <add>, %123, %cst_62 [1] : vector<8x128xf32> to vector<8xf32>
    %125 = vector.shape_cast %124 : vector<8xf32> to vector<8x1xf32>
    %cst_63 = arith.constant 1.280000e+02 : f32
    %126 = vector.broadcast %cst_63 : f32 to vector<8x1xf32>
    %127 = arith.divf %125, %126 : vector<8x1xf32>
    %128 = vector.broadcast %127 : vector<8x1xf32> to vector<8x128xf32>
    %129 = arith.subf %123, %128 : vector<8x128xf32>
    %130 = arith.mulf %129, %129 : vector<8x128xf32>
    %cst_64 = arith.constant dense<0.000000e+00> : vector<8xf32>
    %131 = vector.multi_reduction <add>, %130, %cst_64 [1] : vector<8x128xf32> to vector<8xf32>
    %132 = vector.shape_cast %131 : vector<8xf32> to vector<8x1xf32>
    %cst_65 = arith.constant 1.280000e+02 : f32
    %133 = vector.broadcast %cst_65 : f32 to vector<8x1xf32>
    %134 = arith.divf %132, %133 : vector<8x1xf32>
    %135 = vector.broadcast %127 : vector<8x1xf32> to vector<8x128xf32>
    %136 = arith.subf %123, %135 : vector<8x128xf32>
    %cst_66 = arith.constant 9.99999974E-6 : f32
    %137 = vector.broadcast %cst_66 : f32 to vector<8x1xf32>
    %138 = arith.addf %134, %137 : vector<8x1xf32>
    %139 = math.rsqrt %138 : vector<8x1xf32>
    %140 = vector.broadcast %139 : vector<8x1xf32> to vector<8x128xf32>
    %141 = arith.mulf %136, %140 : vector<8x128xf32>
    %142 = vector.broadcast %22 : vector<1x128xf32> to vector<8x128xf32>
    %143 = arith.mulf %141, %142 : vector<8x128xf32>
    %144 = vector.broadcast %24 : vector<1x128xf32> to vector<8x128xf32>
    %145 = arith.addf %143, %144 : vector<8x128xf32>
    %146 = arith.truncf %145 : vector<8x128xf32> to vector<8x128xbf16>
    %cst_67 = arith.constant dense<0.000000e+00> : vector<8x128xf32>
    %147 = tpu.matmul %146, %14, %cst_67 {dimension_numbers = #tpu.dot_dimension_numbers<[1], [0], [0], [1], [0, 0, 1, 1], [], []>} : vector<8x128xbf16>, vector<128x128xbf16>, vector<8x128xf32> -> vector<8x128xf32>
    %148 = vector.broadcast %16 : vector<1x128xf32> to vector<8x128xf32>
    %149 = arith.addf %147, %148 : vector<8x128xf32>
    %cst_68 = arith.constant 0.000000e+00 : f32
    %150 = vector.broadcast %cst_68 : f32 to vector<8x128xf32>
    %151 = arith.maximumf %149, %150 : vector<8x128xf32>
    %152 = arith.addf %151, %145 : vector<8x128xf32>
    %cst_69 = arith.constant dense<0.000000e+00> : vector<8xf32>
    %153 = vector.multi_reduction <add>, %152, %cst_69 [1] : vector<8x128xf32> to vector<8xf32>
    %154 = vector.shape_cast %153 : vector<8xf32> to vector<8x1xf32>
    %cst_70 = arith.constant 1.280000e+02 : f32
    %155 = vector.broadcast %cst_70 : f32 to vector<8x1xf32>
    %156 = arith.divf %154, %155 : vector<8x1xf32>
    %157 = vector.broadcast %156 : vector<8x1xf32> to vector<8x128xf32>
    %158 = arith.subf %152, %157 : vector<8x128xf32>
    %159 = arith.mulf %158, %158 : vector<8x128xf32>
    %cst_71 = arith.constant dense<0.000000e+00> : vector<8xf32>
    %160 = vector.multi_reduction <add>, %159, %cst_71 [1] : vector<8x128xf32> to vector<8xf32>
    %161 = vector.shape_cast %160 : vector<8xf32> to vector<8x1xf32>
    %cst_72 = arith.constant 1.280000e+02 : f32
    %162 = vector.broadcast %cst_72 : f32 to vector<8x1xf32>
    %163 = arith.divf %161, %162 : vector<8x1xf32>
    %164 = vector.broadcast %156 : vector<8x1xf32> to vector<8x128xf32>
    %165 = arith.subf %152, %164 : vector<8x128xf32>
    %cst_73 = arith.constant 9.99999974E-6 : f32
    %166 = vector.broadcast %cst_73 : f32 to vector<8x1xf32>
    %167 = arith.addf %163, %166 : vector<8x1xf32>
    %168 = math.rsqrt %167 : vector<8x1xf32>
    %169 = vector.broadcast %168 : vector<8x1xf32> to vector<8x128xf32>
    %170 = arith.mulf %165, %169 : vector<8x128xf32>
    %171 = vector.broadcast %26 : vector<1x128xf32> to vector<8x128xf32>
    %172 = arith.mulf %170, %171 : vector<8x128xf32>
    %173 = vector.broadcast %28 : vector<1x128xf32> to vector<8x128xf32>
    %174 = arith.addf %172, %173 : vector<8x128xf32>
    %175 = vector.shape_cast %174 : vector<8x128xf32> to vector<1x8x128xf32>
    %c0_74 = arith.constant 0 : index
    %c0_75 = arith.constant 0 : index
    %c0_76 = arith.constant 0 : index
    %176 = vector.load %arg11[%c0_74, %c0_75, %c0_76] : memref<1x8x128xf32, #tpu.memory_space<vmem>>, vector<1x8x128xf32>
    tpu.vector_store %arg11[%c0_74, %c0_75, %c0_76], %175 {strides = array<i32>} : memref<1x8x128xf32, #tpu.memory_space<vmem>>, vector<1x8x128xf32>,
    return
  }
  func.func @transform_0(%arg0: i32, %arg1: i32) -> (i32, i32, i32) {
    %c0_i32 = arith.constant 0 : i32
    %c0_i32_0 = arith.constant 0 : i32
    %c0_i32_1 = arith.constant 0 : i32
    return %arg0, %c0_i32, %c0_i32_0 : i32, i32, i32
  }
  func.func @transform_1(%arg0: i32, %arg1: i32) -> (i32, i32, i32) {
    %c0_i32 = arith.constant 0 : i32
    %c0_i32_0 = arith.constant 0 : i32
    %c0_i32_1 = arith.constant 0 : i32
    return %arg0, %c0_i32, %c0_i32_0 : i32, i32, i32
  }
  func.func @transform_2(%arg0: i32, %arg1: i32) -> (i32, i32, i32) {
    %c0_i32 = arith.constant 0 : i32
    %c0_i32_0 = arith.constant 0 : i32
    %c0_i32_1 = arith.constant 0 : i32
    return %arg0, %c0_i32, %c0_i32_0 : i32, i32, i32
  }
  func.func @transform_3(%arg0: i32, %arg1: i32) -> (i32, i32, i32) {
    %c0_i32 = arith.constant 0 : i32
    %c0_i32_0 = arith.constant 0 : i32
    %c0_i32_1 = arith.constant 0 : i32
    return %arg0, %c0_i32, %c0_i32_0 : i32, i32, i32
  }
  func.func @transform_4(%arg0: i32, %arg1: i32) -> (i32, i32, i32, i32) {
    %c0_i32 = arith.constant 0 : i32
    %c0_i32_0 = arith.constant 0 : i32
    %c0_i32_1 = arith.constant 0 : i32
    %c0_i32_2 = arith.constant 0 : i32
    return %arg1, %c0_i32, %c0_i32_0, %c0_i32_1 : i32, i32, i32, i32
  }
  func.func @transform_5(%arg0: i32, %arg1: i32) -> (i32, i32, i32) {
    %c0_i32 = arith.constant 0 : i32
    %c0_i32_0 = arith.constant 0 : i32
    %c0_i32_1 = arith.constant 0 : i32
    return %arg1, %c0_i32, %c0_i32_0 : i32, i32, i32
  }
  func.func @transform_6(%arg0: i32, %arg1: i32) -> (i32, i32, i32) {
    %c0_i32 = arith.constant 0 : i32
    %c0_i32_0 = arith.constant 0 : i32
    %c0_i32_1 = arith.constant 0 : i32
    return %arg1, %c0_i32, %c0_i32_0 : i32, i32, i32
  }
  func.func @transform_7(%arg0: i32, %arg1: i32) -> (i32, i32, i32) {
    %c0_i32 = arith.constant 0 : i32
    %c0_i32_0 = arith.constant 0 : i32
    %c0_i32_1 = arith.constant 0 : i32
    return %arg1, %c0_i32, %c0_i32_0 : i32, i32, i32
  }
  func.func @transform_8(%arg0: i32, %arg1: i32) -> (i32, i32, i32) {
    %c0_i32 = arith.constant 0 : i32
    %c0_i32_0 = arith.constant 0 : i32
    %c0_i32_1 = arith.constant 0 : i32
    return %arg1, %c0_i32, %c0_i32_0 : i32, i32, i32
  }
  func.func @transform_9(%arg0: i32, %arg1: i32) -> (i32, i32, i32) {
    %c0_i32 = arith.constant 0 : i32
    %c0_i32_0 = arith.constant 0 : i32
    %c0_i32_1 = arith.constant 0 : i32
    return %arg0, %c0_i32, %c0_i32_0 : i32, i32, i32
  }
}

</mosaic_0001>

<bundles_post_ra>
// kernel: tpu_custom_call.1
= control target key start
LH: loop header
LB: loop body
LE: loop exit
PB: predicated region body
PF: predicated region fallthrough
CT: control target
= control target key end

     0   :  { %s2622_s0 = inlined_call_operand.vmem [shape: f32[2,8,128], index: 0, kind: input, shape index: {}]   ;;  %s2623_s1 = inlined_call_operand.vmem [shape: bf16[2,8,128], index: 1, kind: input, shape index: {}]   ;;  %s2624_s2 = inlined_call_operand.vmem [shape: f32[2,1,8], index: 2, kind: input, shape index: {}]   ;;  %s2625_s3 = inlined_call_operand.hbm [shape: f32[2,1,8], index: 3, kind: input, shape index: {}]   ;;  %s2626_s4 = inlined_call_operand.hbm [shape: bf16[2,2,128,128], index: 4, kind: input, shape index: {}]   ;;  %s2627_s5 = inlined_call_operand.vmem [shape: f32[2,2,128], index: 5, kind: input, shape index: {}]   ;;  %s2628_s6 = inlined_call_operand.hbm [shape: bf16[2,128,128], index: 6, kind: input, shape index: {}]   ;;  %s2629_s7 = inlined_call_operand.hbm [shape: f32[2,1,128], index: 7, kind: input, shape index: {}]   ;;  %s2630_s8 = inlined_call_operand.vmem [shape: f32[2,6,128], index: 8, kind: input, shape index: {}]   ;;  %s2631_s9 = inlined_call_operand.hbm [shape: f32[2,8,128], index: 9, kind: output, shape index: {}]  }
   0x1   :  { %2652 = sst [smem:[#allocation29_spill]] %s2622_s0 }
   0x2   :  { %2653 = sst [smem:[#allocation30_spill]] %s2623_s1 }
   0x3   :  { %2654 = sst [smem:[#allocation31_spill]] %s2624_s2 }
   0x4   :  { %2655 = sst [smem:[#allocation32_spill]] %s2625_s3 }
   0x5   :  { %2656 = sst [smem:[#allocation33_spill]] %s2626_s4 }
   0x6   :  { %2657 = sst [smem:[#allocation34_spill]] %s2627_s5 }
   0x7   :  { %2658 = sst [smem:[#allocation35_spill]] %s2628_s6 }
   0x8   :  { %2659 = sst [smem:[#allocation36_spill]] %s2629_s7 }
   0x9   :  { %2660 = sst [smem:[#allocation37_spill]] %s2630_s8 }
   0xa   :  { %2661 = sst [smem:[#allocation38_spill]] %s2631_s9 }
   0xb   :  { %14 = vsyncpa [#allocation3], 0 }
   0xc   :  { %16 = vsyncpa [#allocation3 + $0x1], 0 }
   0xd   :  { %17 = vsyncpa [#allocation6], 0 }
   0xe   :  { %19 = vsyncpa [#allocation6 + $0x1], 0 }
   0xf   :  { %20 = vsyncpa [#allocation9], 0 }
  0x10   :  { %22 = vsyncpa [#allocation9 + $0x1], 0 }
  0x11   :  { %23 = vsyncpa [#allocation4], 0 }
  0x12   :  { %25 = vsyncpa [#allocation4 + $0x1], 0  ;;  %s2177_s30 = smov 0   ;;  %s2179_s10 = smov 0  }
  0x13   :  { %s2181_s11 = smov 0   ;;  %s2183_s12 = smov 0  }
  0x14   :  { %s2185_s13 = smov 0   ;;  %s2187_s14 = smov 0  }
  0x15   :  { %s2189_s15 = smov 0   ;;  %s2191_s16 = smov 0  }
  0x16   :  { %s2193_s17 = smov 0   ;;  %s2195_s18 = smov 0  }
  0x17   :  { %s2197_s19 = smov 0  }
  0x18 LB: > { %2662 = sst [smem:[#allocation15_spill]] %s2078_s10  ;;  %p136_p0 = scmp.eq.s32.totalorder %s2114_s19, 0  ;;  %s2114_s19 = sphi %s2197_s19, %s31_s19   ;;  %s2110_s18 = sphi %s2195_s18, %s2719_s18   ;;  %s2106_s17 = sphi %s2193_s17, %s2718_s17   ;;  %s2102_s16 = sphi %s2191_s16, %s2717_s16   ;;  %s2098_s15 = sphi %s2189_s15, %s2716_s15   ;;  %s2094_s14 = sphi %s2187_s14, %s2715_s14   ;;  %s2090_s13 = sphi %s2185_s13, %s2714_s13   ;;  %s2086_s12 = sphi %s2183_s12, %s2713_s12   ;;  %s2082_s11 = sphi %s2181_s11, %s2712_s11   ;;  %s2078_s10 = sphi %s2179_s10, %s2711_s10   ;;  %s2074_s30 = sphi %s2177_s30, %s2710_s30  }
  0x19   : > { %2663 = sst [smem:[#allocation16_spill]] %s2082_s11  ;;  %p161_p1 = scmp.ne.s32.totalorder %s2082_s11, %s2078_s10 }
  0x1a   : > { %2664 = sst [smem:[#allocation17_spill]] %s2086_s12  ;;  %p2637_p2 = scmp.lt.s32.totalorder %s2114_s19, 4 }
  0x1b   : > { %2665 = sst [smem:[#allocation18_spill]] %s2090_s13  ;;  %s358_s21 = sand.u32 1, %s2114_s19  }
  0x1c   : > { %2666 = sst [smem:[#allocation19_spill]] %s2094_s14  ;;  %p163_p3 = por %p161_p1, %p136_p0 }
  0x1d   : > { %2667 = sst [smem:[#allocation20_spill]] %s2106_s17  ;;  %s2241_s22 = sand.u32 1, %s2082_s11  }
  0x1e   : > { %2668 = sst [smem:[#allocation21_spill]] %s2110_s18  ;;  %s1563_s23 = sshll.u32 %s2106_s17, 11 }
  0x1f   : > { %2669 = sst [smem:[#allocation22_spill]] %s2114_s19  ;;  %s1488_s24 = sshll.u32 %s2241_s22, 7 }
  0x20   : > { %s2670_s4 = sld [smem:[#allocation33_spill]]  ;;  %p2250_p4 = pnand %p2637_p2, %p163_p3 }
  0x21   : > { %s362_s29 = scalar_lea.vmem [#allocation5], %s1488_s24  ;;  %p1495_p5 = scmp.ge.s32.totalorder %s2114_s19, 1 }
  0x22   : > { %s369_s20 = sshll.u32 %s362_s29, 4  ;;  %s2255_s9 = scalar_lea.sflag [#allocation6], %s358_s21  ;;  %s370_s20 = int_to_ptr.vmem [resolvable:$true] %s369_s20 }
  0x23   : > { %p2635_p6 = pneg %p2250_p4  ;;  %s1887_s8 = scalar_lea.vmem %s370_s20, 2048 }
  0x24   : > { %p1888_p7 = scmp.ne.s32.totalorder %s370_s20, %s1887_s8 }
  0x26   : > { %s368_s27 = scalar_lea.hbm %s2670_s4, %s1563_s23  ;;  %p1890_p8 = pnand %p1888_p7, %p2635_p6 }
  0x27   : > { %s2116_s23 = smov [#allocation5]  }
  0x28   : > { %p1891_p9 = pneg %p1890_p8  ;;  %s1892_s25 = sshll.u32 %s2116_s23, 4  ;;  %s1893_s25 = int_to_ptr.vmem [resolvable:$false] %s1892_s25 }
  0x29   : > { %s1894_s26 = scalar_lea.vmem %s1893_s25, 4096  ;;  %p1895_p10 = scmp.lt.s32.totalorder %s370_s20, %s1893_s25 }
  0x2a   : > { %p1896_p11 = scmp.lt.s32.totalorder %s1894_s26, %s1887_s8 }
  0x2c   : > { %p1897_p12 = por %p1896_p11, %p1895_p10 }
  0x2e   : > { %p1898_p13 = pnand %p1897_p12, %p1891_p9 }
  0x30   : > { %1901 = shalt.err (!%p1898_p13)
}
  0x31   : > { %s2633_s24 = smov 64   ;;  %s2634_s8 = smov 4  }
  0x32   : > { %1729 = dma.hbm_to_vmem [thread:$0]  (!%p2250_p4), %s368_s27, 2048, %s370_s20, %s2255_s9, %s2633_s24, %s2633_s24, %s2634_s8  }
  0x33   : > { %p429_p1 = scmp.lt.s32.totalorder %s2114_s19, 5  ;;  %s2276_s29 = sadd.s32 4294967295, %s2114_s19  }
  0x34   : > { %s1484_s23 = sadd.s32 4294967294, %s2114_s19   ;;  %s40_s25 = sadd.s32 1, %s2106_s17 }
  0x35   : > { %p2271_p3 = pnand %p1495_p5, %p429_p1  ;;  %s43_s26 = sadd.s32 1, %s2110_s18 }
  0x36   : > { %p41_p7 = scmp.ge.s32.totalorder %s40_s25, 2  ;;  %s128_s20 = sadd.s32 1, %s2094_s14 }
  0x37   : > { %p135_p8 = scmp.ne.s32.totalorder %s2094_s14, %s2090_s13  ;;  %p141_p9 = scmp.ne.s32.totalorder %s2090_s13, %s2086_s12 }
  0x38   : > { %s2721_s25 = smov (%p41_p7, %s40_s25), 0  ;;  %s2723_s26 = smov (!%p41_p7, %s43_s26), %s2110_s18 }
  0x39   : > { %2673 = sst [smem:[#allocation23_spill]] %s2721_s25  ;;  %p2294_p5 = por %p136_p0, %p135_p8 }
  0x3a   : > { %p142_p10 = scmp.eq.s32.totalorder %s2276_s29, 0  ;;  %p45_p11 = scmp.ge.s32.totalorder %s2723_s26, 2 }
  0x3b   : > { %s151_s24 = ssub.s32 %s2106_s17, %s2721_s25  ;;  %s2677_s4 = sadd.s32 1, %s2082_s11 }
  0x3c   : > { %p2304_p12 = por %p142_p10, %p141_p9  ;;  %p152_p13 = scmp.eq.s32.totalorder %s151_s24, 0 }
  0x3d   : > { %s2725_s26 = smov (%p45_p11, %s2723_s26), 0  ;;  %p167_p0 = scmp.ne.s32.totalorder %s2078_s10, %s2074_s30 }
  0x3e   : > { %2676 = sst [smem:[#allocation24_spill]] %s2725_s26  ;;  %s125_s2 = ssub.s32 %s2110_s18, %s2725_s26 }
  0x3f   : > { %s2313_s5 = scalar_select %p152_p13, %s2082_s11, %s2677_s4  }
  0x40   : > { %p126_p1 = scmp.eq.s32.totalorder %s125_s2, 0  ;;  %p295_p7 = scmp.eq.s32.totalorder %s2276_s29, 3 }
  0x41   : > { %2678 = sst [smem:[#allocation25_spill]] %s2313_s5  ;;  %p2320_p6 = por %p167_p0, %p142_p10 }
  0x42   : > { %p301_p2 = scmp.eq.s32.totalorder %s1484_s23, 3  ;;  %p2330_p11 = por %p295_p7, %p135_p8 }
  0x43   : > { %s2325_s24 = scalar_select %p126_p1, %s2094_s14, %s128_s20  }
  0x44   : > { %s2681_s1 = scalar_select %p2330_p11, 1, 0 }
  0x45   : > { %2680 = sst [smem:[#allocation26_spill]] %s2325_s24  ;;  %p2337_p13 = por %p301_p2, %p141_p9 }
  0x46   : > { %2682 = sst [smem:[#allocation27_spill]] %s2681_s1  ;;  %s341_s30 = sand.u32 1, %s2094_s14  }
  0x47   : > { %s2683_s4 = scalar_select %p2337_p13, 1, 0 }
  0x48   : > { %s1487_s2 = sshll.u32 %s2110_s18, 4  ;;  %s2685_s3 = sld [smem:[#allocation32_spill]] }
  0x49   : > { %2684 = sst [smem:[#allocation28_spill]] %s2683_s4  ;;  %s344_s0 = scalar_lea.vmem [#allocation2], %s341_s30 }
  0x4a   : > { %s351_s23 = sshll.u32 %s344_s0, 4  ;;  %p2686_p10 = scmp.lt.s32.totalorder %s2114_s19, 4  ;;  %s352_s23 = int_to_ptr.vmem [resolvable:$true] %s351_s23 }
  0x4b   : > { %s1491_s24 = sshll.u32 %s2241_s22, 6  ;;  %s1564_s12 = sshll.u32 %s2106_s17, 10 }
  0x4c   : > { %p2350_p8 = pnand %p2686_p10, %p2294_p5  ;;  %s342_s1 = scalar_lea.sflag [#allocation3], %s341_s30 }
  0x4d   : > { %s1915_s18 = scalar_lea.vmem %s352_s23, 16  ;;  %s2119_s5 = smov [#allocation2]  }
  0x4e   : > { %s349_s11 = scalar_lea.hbm %s2685_s3, %s1487_s2  ;;  %p1904_p2 = pneg %p2350_p8 }
  0x4f   : > { %p1916_p9 = scmp.ne.s32.totalorder %s352_s23, %s1915_s18  ;;  %s1920_s26 = sshll.u32 %s2119_s5, 4  ;;  %s1921_s26 = int_to_ptr.vmem [resolvable:$false] %s1920_s26 }
  0x50   : > { %s1922_s0 = scalar_lea.vmem %s1921_s26, 32  ;;  %p1923_p7 = scmp.lt.s32.totalorder %s352_s23, %s1921_s26 }
  0x51   : > { %p1918_p0 = pnand %p1916_p9, %p1904_p2  ;;  %p1924_p13 = scmp.lt.s32.totalorder %s1922_s0, %s1915_s18 }
  0x53   : > { %p1919_p1 = pneg %p1918_p0  ;;  %p1925_p5 = por %p1924_p13, %p1923_p7 }
  0x55   : > { %p1926_p10 = pnand %p1925_p5, %p1919_p1 }
  0x57   : > { %1929 = shalt.err (!%p1926_p10)
}
  0x58   : > { %1726 = dma.hbm_to_vmem [thread:$0]  (!%p2350_p8), %s349_s11, 16, %s352_s23, %s342_s1  }
  0x59   : > { %s2688_s6 = sld [smem:[#allocation35_spill]]  ;;  %s390_s3 = scalar_lea.vmem [#allocation7], %s1491_s24 }
  0x5a   : > { %s397_s14 = sshll.u32 %s390_s3, 4  ;;  %p2689_p9 = pneg %p2250_p4  ;;  %s398_s14 = int_to_ptr.vmem [resolvable:$true] %s397_s14 }
  0x5b   : > { %s1943_s4 = scalar_lea.vmem %s398_s14, 1024  ;;  %s2120_s18 = smov [#allocation7]  }
  0x5c   : > { %p1944_p2 = scmp.ne.s32.totalorder %s398_s14, %s1943_s4  ;;  %s1948_s5 = sshll.u32 %s2120_s18, 4  ;;  %s1949_s5 = int_to_ptr.vmem [resolvable:$false] %s1948_s5 }
  0x5d   : > { %s1950_s26 = scalar_lea.vmem %s1949_s5, 2048  ;;  %p1951_p13 = scmp.lt.s32.totalorder %s398_s14, %s1949_s5 }
  0x5e   : > { %p1946_p0 = pnand %p1944_p2, %p2689_p9  ;;  %p1952_p1 = scmp.lt.s32.totalorder %s1950_s26, %s1943_s4 }
  0x5f   : > { %s396_s2 = scalar_lea.hbm %s2688_s6, %s1564_s12 }
  0x60   : > { %p1947_p11 = pneg %p1946_p0  ;;  %p1953_p8 = por %p1952_p1, %p1951_p13 }
  0x62   : > { %p1954_p7 = pnand %p1953_p8, %p1947_p11 }
  0x64   : > { %1957 = shalt.err (!%p1954_p7)
}
  0x65   : > { %s2690_s1 = smov 4   ;;  %s2691_s3 = smov 64  }
  0x66   : > { %1732 = dma.hbm_to_vmem [thread:$0]  (!%p2250_p4), %s396_s2, 1024, %s398_s14, %s2255_s9, %s2691_s3, %s2691_s3, %s2690_s1  }
  0x67   : > { %s1494_s11 = sshll.u32 %s2106_s17, 4  ;;  %s2692_s7 = sld [smem:[#allocation36_spill]] }
  0x68   : > { %s410_s4 = scalar_lea.vmem [#allocation8], %s2241_s22  ;;  %s408_s0 = scalar_lea.sflag [#allocation9], %s2241_s22 }
  0x69   : > { %s417_s20 = sshll.u32 %s410_s4, 4  ;;  %p2693_p5 = pmov %p2689_p9  ;;  %s418_s20 = int_to_ptr.vmem [resolvable:$true] %s417_s20 }
  0x6a   : > { %s1971_s27 = scalar_lea.vmem %s418_s20, 16  ;;  %s2121_s30 = smov [#allocation8]  }
  0x6b   : > { %p1972_p11 = scmp.ne.s32.totalorder %s418_s20, %s1971_s27  ;;  %s1976_s18 = sshll.u32 %s2121_s30, 4  ;;  %s1977_s18 = int_to_ptr.vmem [resolvable:$false] %s1976_s18 }
  0x6c   : > { %s1978_s5 = scalar_lea.vmem %s1977_s18, 32  ;;  %p1979_p9 = scmp.lt.s32.totalorder %s418_s20, %s1977_s18 }
  0x6d   : > { %s415_s23 = scalar_lea.hbm %s2692_s7, %s1494_s11  ;;  %p1974_p10 = pnand %p1972_p11, %p2693_p5 }
  0x6e   : > { %p1980_p0 = scmp.lt.s32.totalorder %s1978_s5, %s1971_s27 }
  0x6f   : > { %p1975_p2 = pneg %p1974_p10 }
  0x70   : > { %p1981_p13 = por %p1980_p0, %p1979_p9 }
  0x72   : > { %p1982_p1 = pnand %p1981_p13, %p1975_p2 }
  0x74   : > { %1985 = shalt.err (!%p1982_p1)
}
  0x75   : > { %1735 = dma.hbm_to_vmem [thread:$0]  (!%p2250_p4), %s415_s23, 16, %s418_s20, %s408_s0  }
  0x76   : > { %433 = sbr.rel (%p2271_p3) target bundleno = 3244 (0xcac), region = 56  ;;  %s2386_s9 = sand.u32 (!%p2271_p3), 1, %s2090_s13  }
  0x77   : > { %s436_s14 = scalar_lea.sflag (!%p2271_p3), [#allocation3], %s2386_s9 }
  0x7b   : > { %2057 = dma.done.wait (%p2304_p12), %s436_s14, 16  }
  0x7c   : > { %2059 = vsyncadd (%p2304_p12), %s436_s14, 4294967280  ;;  %s443_s28 = sand.u32 1, %s2276_s29   ;;  %s2396_s2 = sand.u32 1, %s2078_s10  }
  0x7d   : > { %s1496_s21 = sshll.u32 %s2396_s2, 7  ;;  %s444_s26 = scalar_lea.sflag [#allocation6], %s443_s28 }
  0x7e   : > { %s2399_s1 = scalar_lea.vmem [#allocation5], %s1496_s21 }
  0x7f   : > { %2061 = dma.done.wait (%p2320_p6), %s444_s26, 3072  }
  0x80   : > { %2063 = vsyncadd (%p2320_p6), %s444_s26, 4294964224  ;;  %s1497_s8 = sshll.u32 %s2396_s2, 6  ;;  %s462_s29 = scalar_lea.sflag [#allocation9], %s2396_s2 }
  0x81   : > { %s2406_s3 = scalar_lea.vmem [#allocation7], %s1497_s8 }
  0x82   : > { %2065 = dma.done.wait (%p2320_p6), %s462_s29, 16  }
  0x83   : > { %2067 = vsyncadd (%p2320_p6), %s462_s29, 4294967280  ;;  %s1498_s12 = sshll.u32 %s2386_s9, 3  ;;  %p531_p4 = scmp.lt.s32.totalorder %s2102_s16, 1 }
  0x84   : > { %p542_p3 = scmp.lt.s32.totalorder %s2098_s15, 1  ;;  %s2694_s25 = sld [smem:[#allocation29_spill]] }
  0x85   : > { %s2418_s24 = scalar_select %p531_p4, %s2102_s16, 1 }
  0x86   : > { %s543_s23 = scalar_select %p542_p3, %s2098_s15, 1 }
  0x87   : > { %s1499_s4 = sshll.u32 %s2418_s24, 3  ;;  %s1500_s20 = sshll.u32 %s2418_s24, 2 }
  0x88   : > { %s2695_s14 = sld [smem:[#allocation30_spill]]  ;;  %s1501_s11 = sshll.u32 %s543_s23, 1 }
  0x89   : > { %s2696_s8 = sld [smem:[#allocation31_spill]]  ;;  %s1502_s13 = sshll.u32 %s543_s23, 3 }
  0x8a   : > { %s534_s30 = scalar_lea.vmem %s2694_s25, %s1499_s4  ;;  %s2697_s7 = sld [smem:[#allocation34_spill]] }
  0x8b   : > { %s2698_s0 = sld [smem:[#allocation37_spill]]  ;;  %s2445_s27 = scalar_lea.vmem [#allocation10], %s1498_s12 }
  0x8c   : > { %p1503_p6 = scmp.ne.s32.totalorder %s2098_s15, 0 }
  0x8e   : > { %s2429_s28 = scalar_lea.vmem %s2695_s14, %s1500_s20  ;;  %554 = sbr.rel (%p1503_p6) target bundleno = 149 (0x95), region = 76 }
  0x8f   : > { %s541_s29 = scalar_lea.vmem %s2696_s8, %s2418_s24 }
  0x90   : > { %s2438_s17 = scalar_lea.vmem %s2697_s7, %s1501_s11 }
  0x91   : > { %s2443_s4 = scalar_lea.vmem %s2698_s0, %s1502_s13 }
  0x93   : > { %v555_v0 = vld [vmem:[%s534_s30] sm:$0xff] }
  0x94   : > { %556 = vst [vmem:[%s2445_s27] sm:$0xff] %v555_v0 }
  0x95 PF: > { %v1836_v1 = vld [vmem:[%s2399_s1 + $0x38] sm:$0xff]   ;;  %v2122_v2 = vmov 0.0   ;;  %v1837_v3 = vld [vmem:[%s2399_s1 + $0x30] sm:$0xff]   ;;  %vm2123_vm0 = vmmov 0   ;;  %v1838_v4 = vld [vmem:[%s2399_s1 + $0x28] sm:$0xff]   ;;  %s2124_s6 = smov 64   ;;  %v617_v21 = vlaneseq }
  0x96   : > { %1609 = vmatprep.subr.bf16.mxu0 %v2122_v2  ;;  %1629 = vmatprep.subr.bf16.mxu1 %v2122_v2  ;;  %v1839_v5 = vld [vmem:[%s2399_s1 + $0x20] sm:$0xff]   ;;  %v1840_v6 = vld [vmem:[%s2399_s1 + $0x18] sm:$0xff]   ;;  %v1841_v7 = vld [vmem:[%s2399_s1 + $0x10] sm:$0xff]   ;;  %vm720_vm1 = vcmask 523264   ;;  %v2125_v24 = vmov -1e+09  }
  0x97   : > { %1610 = vmatpush3.bf16.msra.mxu0 %v1836_v1  ;;  %1625 = vmatprep.mubr.msk.bf16.mxu0 %vm2123_vm0, %v2122_v2  ;;  %v1842_v8 = vld [vmem:[%s2399_s1 + $0x8] sm:$0xff]   ;;  %v1843_v9 = vld [vmem:[%s2399_s1] sm:$0xff]   ;;  %v1520_v12 = vld [vmem:[%s2438_s17] ss:$0 sm:$0xff]  ;;  %v618_v22 = vshrl.u32 %v617_v21, 7  ;;  %v620_v23 = vand.u32 127, %v617_v21 }
  0x98   : > { %1611 = vmatprep.subr.bf16.mxu0 %v2122_v2  ;;  %1631 = vmatprep.mubr.msk.bf16.mxu1 %vm2123_vm0, %v2122_v2  ;;  %v1530_v27 = vld [vmem:[%s541_s29] ss:$0 sm:$0xff]  ;;  %vm775_vm3 = vcmask 64512   ;;  %vm791_vm4 = vcmask 1043456   ;;  %v1845_v50 = vld [vmem:[%s2399_s1 + $0x70] sm:$0xff]   ;;  %v1846_v51 = vld [vmem:[%s2399_s1 + $0x68] sm:$0xff]  }
  0x99   : > { %vm621_vm2 = vcmp.le.s32.totalorder %v620_v23, %v618_v22  ;;  %v1844_v44 = vld [vmem:[%s2399_s1 + $0x78] sm:$0xff]   ;;  %v1847_v52 = vld [vmem:[%s2399_s1 + $0x60] sm:$0xff]   ;;  %v1849_v54 = vld [vmem:[%s2399_s1 + $0x50] sm:$0xff]   ;;  %s2700_s15 = scalar_lea.vmem [#allocation2], %s2386_s9  ;;  %s2702_s19 = sld [smem:[#allocation27_spill]] }
  0x9a   : > { %v622_v25 = vsel %vm621_vm2, 0.0, %v2125_v24  ;;  %v1848_v53 = vld [vmem:[%s2399_s1 + $0x58] sm:$0xff]   ;;  %v1850_v55 = vld [vmem:[%s2399_s1 + $0x48] sm:$0xff]   ;;  %v1851_v56 = vld [vmem:[%s2399_s1 + $0x40] sm:$0xff]   ;;  %s1560_s22 = sshll.u32 %s2102_s16, 7  ;;  %s2703_s11 = sld [smem:[#allocation38_spill]] }
  0x9b   : > { %1612 = vmatpush3.bf16.msra.mxu0 %v1837_v3  ;;  %v557_v10 = vld [vmem:[%s2445_s27] sm:$0xff]  ;;  %v1534_v1 = vld [vmem:[%s2438_s17 + $0x1] ss:$0 sm:$0xff]  ;;  %s2701_s17 = scalar_lea.vmem [#allocation8], %s2396_s2  ;;  %s1285_s2 = sshll.u32 %s2445_s27, 4  ;;  %s1286_s2 = int_to_ptr.vmem [resolvable:$true] %s1285_s2 }
  0x9c   : > { %1613 = vmatprep.subr.bf16.mxu0 %v2122_v2  ;;  %v623_v11 = vpack.c.bf16 %v557_v10, %v557_v10  ;;  %s1272_s23 = scalar_lea.sflag [#allocation4], %s2386_s9  ;;  %s1986_s20 = scalar_lea.vmem %s1286_s2, 128 }
  0x9d   : > { %p1987_p12 = scmp.ne.s32.totalorder %s1286_s2, %s1986_s20  ;;  %s2126_s25 = smov [#allocation10]  }
  0x9e   : > { %v793_v39 = vsel %vm791_vm4, %v623_v11, 0  ;;  %s1990_s30 = sshll.u32 %s2126_s25, 4  ;;  %s1991_s30 = int_to_ptr.vmem [resolvable:$false] %s1990_s30 }
  0x9f   : > { %1614 = vmatpush3.bf16.msra.mxu0 %v1838_v4  ;;  %p2705_p8 = scmp.ne.s32.totalorder %s2702_s19, 0  ;;  %s1992_s18 = scalar_lea.vmem %s1991_s30, 256 }
  0xa0   : > { %1615 = vmatprep.subr.bf16.mxu0 %v2122_v2  ;;  %s2704_s24 = smov %s2703_s11  ;;  %s1283_s12 = scalar_lea.hbm %s2703_s11, %s1560_s22 }
  0xa1   : > { %p1988_p7 = pnand %p1987_p12, %p2705_p8  ;;  %p1993_p5 = scmp.lt.s32.totalorder %s1286_s2, %s1991_s30 }
  0xa2   : > { %p1994_p10 = scmp.lt.s32.totalorder %s1992_s18, %s1986_s20 }
  0xa3   : > { %1616 = vmatpush3.bf16.msra.mxu0 %v1839_v5  ;;  %p1989_p11 = pneg %p1988_p7 }
  0xa4   : > { %1617 = vmatprep.subr.bf16.mxu0 %v2122_v2  ;;  %p1995_p2 = por %p1994_p10, %p1993_p5 }
  0xa6   : > { %p1996_p9 = pnand %p1995_p2, %p1989_p11 }
  0xa7   : > { %1618 = vmatpush3.bf16.msra.mxu0 %v1840_v6 }
  0xa8   : > { %1619 = vmatprep.subr.bf16.mxu0 %v2122_v2 }
  0xab   : > { %1620 = vmatpush3.bf16.msra.mxu0 %v1841_v7 }
  0xac   : > { %1621 = vmatprep.subr.bf16.mxu0 %v2122_v2 }
  0xaf   : > { %1622 = vmatpush3.bf16.msra.mxu0 %v1842_v8 }
  0xb0   : > { %1623 = vmatprep.subr.bf16.mxu0 %v2122_v2 }
  0xb3   : > { %1624 = vmatpush3.bf16.msra.mxu0 %v1843_v9 }
  0xb4   : > { %1661 = vmatprep.subr.bf16.mxu0 %v2122_v2 }
  0xb6   : > { %1626 = vmatmul.mubr.bf16.vlgmr.msra.gmra.mxu0 %v623_v11 }
  0xb7   : > { %1677 = vmatprep.mubr.msk.bf16.mxu0 %vm2123_vm0, %v2122_v2 }
 0x176   : > { %v710_v13 = vpop.f32.mrf.mxu0 }
 0x177   : > { %v711_v14 = vadd.f32 %v1520_v12, %v710_v13  ;;  %v1532_v12 = vld [vmem:[%s2443_s4] ss:$0 sm:$0xff] }
 0x178   : > { %v1627_v15 = vpop.f32.mrf.mxu0 }
 0x179   : > { %v716_v16 = vpack.c.bf16 %v711_v14, %v711_v14  ;;  %v1533_v14 = vld [vmem:[%s2443_s4 + $0x1] ss:$0 sm:$0xff] }
 0x17a   : > { %v713_v17 = vpop.f32.mrf.mxu0 }
 0x17b   : > { %718 = vrot.lane.b32.xlu0 %v716_v16, %s2124_s6 }
 0x17c   : > { %v1628_v18 = vpop.f32.mrf.mxu0 }
 0x1ed   : > { %v719_v19 = vpop.permute.xlu0 %718 }
 0x1ee   : > { %v725_v20 = vsel %vm720_vm1, %v719_v19, 0 }
 0x1ef   : > { %1630 = vmatpush3.bf16.xpose.msra.mxu1 %v725_v20 }
 0x1f0   : > { %1635 = vmatprep.subr.bf16.mxu1 %v2122_v2 }
 0x1f6   : > { %1632 = vmatmul.mubr.msk.bf16.vlgmr.msra.gmra.mxu1 %vm720_vm1, %v716_v16 }
 0x1f7   : > { %1637 = vmatprep.mubr.msk.bf16.mxu1 %vm2123_vm0, %v2122_v2  ;;  %1636 = vmatpush3.bf16.msra.mxu1 %v793_v39 }
 0x1f8   : > { %1641 = vmatprep.subr.bf16.mxu1 %v2122_v2 }
 0x2b6   : > { %v761_v26 = vpop.f32.mrf.mxu1 }
 0x2b7   : > { %v762_v28 = vadd.f32 %v761_v26, %v622_v25 }
 0x2b8   : > { %v1633_v29 = vpop.f32.mrf.mxu1 }
 0x2b9   : > { %v774_v30 = vadd.f32 %v1530_v27, %v762_v28 }
 0x2ba   : > { %v764_v31 = vpop.f32.mrf.mxu1 }
 0x2bb   : > { %v776_v32 = vsel %vm775_vm3, %v774_v30, -inf }
 0x2bc   : > { %777 = vmax.xlane.f32.xlu0 %v776_v32  ;;  %v1634_v33 = vpop.f32.mrf.mxu1  ;;  %v1543_v32 = vld [vmem:[%s2700_s15] ss:$0 sm:$0xff] }
 0x2d2   : > { %962 = vrot.lane.b32.xlu0 %v1845_v50, %s2124_s6 }
 0x2d6   : > { %960 = vrot.lane.b32.xlu0 %v1846_v51, %s2124_s6 }
 0x2da   : > { %958 = vrot.lane.b32.xlu0 %v1847_v52, %s2124_s6 }
 0x2de   : > { %954 = vrot.lane.b32.xlu0 %v1849_v54, %s2124_s6 }
 0x2e2   : > { %952 = vrot.lane.b32.xlu0 %v1850_v55, %s2124_s6 }
 0x2e6   : > { %950 = vrot.lane.b32.xlu0 %v1851_v56, %s2124_s6 }
 0x2ea   : > { %975 = vrot.lane.b32.xlu0 %v1534_v1, %s2124_s6 }
 0x345   : > { %v778_v34 = vpop.xlane.xlu0 %777 }
 0x346   : > { %v779_v35 = vsub.f32 %v774_v30, %v778_v34 }
 0x348   : > { %v780_v36 = vmul.f32 1.442695, %v779_v35 }
 0x349   : > { %v963_v59 = vpop.permute.xlu0 %962 }
 0x34a   : > { %1860 = vpow2.f32 %v780_v36 }
 0x34d   : > { %v961_v63 = vpop.permute.xlu0 %960 }
 0x351   : > { %v959_v0 = vpop.permute.xlu0 %958 }
 0x355   : > { %v955_v5 = vpop.permute.xlu0 %954 }
 0x357   : > { %v1861_v37 = vpop.eup %1860 }
 0x358   : > { %v782_v38 = vsel %vm775_vm3, %v1861_v37, 0.0 }
 0x359   : > { %783 = vadd.xlane.f32.xlu1 %v782_v38  ;;  %v953_v8 = vpop.permute.xlu0 %952 }
 0x35d   : > { %v951_v9 = vpop.permute.xlu0 %950 }
 0x361   : > { %v976_v18 = vpop.permute.xlu0 %975 }
 0x3e2   : > { %v784_v40 = vpop.xlane.xlu1 %783 }
 0x3e3   : > { %1862 = vrcp.f32 %v784_v40 }
 0x3f0   : > { %v1863_v41 = vpop.eup %1862 }
 0x3f1   : > { %v786_v42 = vmul.f32 %v1863_v41, %v1861_v37 }
 0x3f3   : > { %v787_v43 = vpack.c.bf16 %v786_v42, %v786_v42 }
 0x3f5   : > { %1638 = vmatmul.mubr.msk.bf16.vlgmr.msra.gmra.mxu1 %vm775_vm3, %v787_v43 }
 0x3f6   : > { %1657 = vmatprep.mubr.msk.bf16.mxu1 %vm2123_vm0, %v2122_v2  ;;  %1642 = vmatpush3.bf16.msra.mxu1 %v1844_v44 }
 0x3f7   : > { %1643 = vmatprep.subr.bf16.mxu1 %v2122_v2 }
 0x3fa   : > { %1644 = vmatpush3.bf16.msra.mxu1 %v1845_v50 }
 0x3fb   : > { %1645 = vmatprep.subr.bf16.mxu1 %v2122_v2 }
 0x3fe   : > { %1646 = vmatpush3.bf16.msra.mxu1 %v1846_v51 }
 0x3ff   : > { %1647 = vmatprep.subr.bf16.mxu1 %v2122_v2 }
 0x402   : > { %1648 = vmatpush3.bf16.msra.mxu1 %v1847_v52 }
 0x403   : > { %1649 = vmatprep.subr.bf16.mxu1 %v2122_v2 }
 0x406   : > { %1650 = vmatpush3.bf16.msra.mxu1 %v1848_v53 }
 0x407   : > { %1651 = vmatprep.subr.bf16.mxu1 %v2122_v2 }
 0x40a   : > { %1652 = vmatpush3.bf16.msra.mxu1 %v1849_v54  ;;  %v1852_v54 = vld [vmem:[%s2406_s3 + $0x38] sm:$0xff]  }
 0x40b   : > { %1653 = vmatprep.subr.bf16.mxu1 %v2122_v2 }
 0x40e   : > { %1654 = vmatpush3.bf16.msra.mxu1 %v1850_v55  ;;  %v1853_v55 = vld [vmem:[%s2406_s3 + $0x30] sm:$0xff]  }
 0x40f   : > { %1655 = vmatprep.subr.bf16.mxu1 %v2122_v2 }
 0x412   : > { %1656 = vmatpush3.bf16.msra.mxu1 %v1851_v56 }
 0x413   : > { %1681 = vmatprep.subr.bf16.mxu1 %v2122_v2 }
 0x4b5   : > { %v829_v45 = vpop.f32.mrf.mxu1 }
 0x4b6   : > { %v830_v46 = vadd.f32 %v829_v45, %v557_v10  ;;  %v558_v10 = vld [vmem:[%s2429_s28] sm:$0xf] }
 0x4b7   : > { %v1639_v47 = vpop.f32.mrf.mxu1 }
 0x4b8   : > { %835 = vadd.xlane.f32.xlu1 %v830_v46 }
 0x4b9   : > { %v832_v48 = vpop.f32.mrf.mxu1 }
 0x4bb   : > { %v1640_v49 = vpop.f32.mrf.mxu1 }
 0x4c9   : > { %964 = vrot.lane.b32.xlu1 %v1844_v44, %s2124_s6  ;;  %v1089_v44 = vsel %vm791_vm4, %v558_v10, 0 }
 0x541   : > { %v836_v57 = vpop.xlane.xlu1 %835 }
 0x542   : > { %v838_v58 = vmul.f32 0.0078125, %v836_v57 }
 0x544   : > { %v839_v60 = vsub.f32 %v830_v46, %v838_v58 }
 0x545   : > { %v965_v61 = vpop.permute.xlu1 %964 }
 0x546   : > { %v840_v62 = vmul.f32 %v839_v60, %v839_v60  ;;  %1662 = vmatpush3.bf16.msra.mxu0 %v965_v61  ;;  %v1855_v61 = vld [vmem:[%s2406_s3 + $0x20] sm:$0xff]  }
 0x547   : > { %1663 = vmatprep.subr.bf16.mxu0 %v2122_v2 }
 0x548   : > { %841 = vadd.xlane.f32.xlu1 %v840_v62  ;;  %v1856_v62 = vld [vmem:[%s2406_s3 + $0x18] sm:$0xff]  }
 0x54a   : > { %1664 = vmatpush3.bf16.msra.mxu0 %v963_v59 }
 0x54b   : > { %1665 = vmatprep.subr.bf16.mxu0 %v2122_v2 }
 0x54e   : > { %1666 = vmatpush3.bf16.msra.mxu0 %v961_v63  ;;  %v1857_v63 = vld [vmem:[%s2406_s3 + $0x10] sm:$0xff]  }
 0x54f   : > { %1667 = vmatprep.subr.bf16.mxu0 %v2122_v2 }
 0x552   : > { %1668 = vmatpush3.bf16.msra.mxu0 %v959_v0  ;;  %v1858_v0 = vld [vmem:[%s2406_s3 + $0x8] sm:$0xff]  }
 0x553   : > { %1669 = vmatprep.subr.bf16.mxu0 %v2122_v2 }
 0x559   : > { %956 = vrot.lane.b32.xlu1 %v1848_v53, %s2124_s6 }
 0x5d1   : > { %v842_v3 = vpop.xlane.xlu1 %841 }
 0x5d2   : > { %v843_v4 = vmul.f32 0.0078125, %v842_v3 }
 0x5d4   : > { %v844_v6 = vadd.f32 1e-05, %v843_v4 }
 0x5d5   : > { %v957_v7 = vpop.permute.xlu1 %956 }
 0x5d6   : > { %1864 = vrsqrt.f32 %v844_v6  ;;  %1670 = vmatpush3.bf16.msra.mxu0 %v957_v7  ;;  %v1546_v7 = vld [vmem:[%s2443_s4 + $0x2] ss:$0 sm:$0xff] }
 0x5d7   : > { %1671 = vmatprep.subr.bf16.mxu0 %v2122_v2 }
 0x5da   : > { %1672 = vmatpush3.bf16.msra.mxu0 %v955_v5 }
 0x5db   : > { %1673 = vmatprep.subr.bf16.mxu0 %v2122_v2 }
 0x5de   : > { %1674 = vmatpush3.bf16.msra.mxu0 %v953_v8 }
 0x5df   : > { %1675 = vmatprep.subr.bf16.mxu0 %v2122_v2 }
 0x5e2   : > { %1676 = vmatpush3.bf16.msra.mxu0 %v951_v9  ;;  %v1547_v9 = vld [vmem:[%s2443_s4 + $0x3] ss:$0 sm:$0xff] }
 0x5e3   : > { %v1865_v11 = vpop.eup %1864  ;;  %1693 = vmatprep.subr.bf16.mxu0 %v2122_v2 }
 0x5e4   : > { %v846_v13 = vmul.f32 %v1865_v11, %v839_v60  ;;  %v1854_v60 = vld [vmem:[%s2406_s3 + $0x28] sm:$0xff]  }
 0x5e5   : > { %1678 = vmatmul.mubr.bf16.vlgmr.msra.gmra.mxu0 %v558_v10 }
 0x5e6   : > { %v851_v15 = vmul.f32 %v1532_v12, %v846_v13  ;;  %1709 = vmatprep.mubr.msk.bf16.mxu0 %vm2123_vm0, %v2122_v2  ;;  %1694 = vmatpush3.bf16.msra.mxu0 %v1852_v54  ;;  %v1548_v13 = vld [vmem:[%s2701_s17] ss:$0 sm:$0xff] }
 0x5e7   : > { %1695 = vmatprep.subr.bf16.mxu0 %v2122_v2 }
 0x5e8   : > { %v856_v16 = vadd.f32 %v1533_v14, %v851_v15 }
 0x5ea   : > { %v857_v17 = vpack.c.bf16 %v856_v16, %v856_v16  ;;  %1696 = vmatpush3.bf16.msra.mxu0 %v1853_v55 }
 0x5eb   : > { %1697 = vmatprep.subr.bf16.mxu0 %v2122_v2 }
 0x5ec   : > { %1658 = vmatmul.mubr.bf16.vlgmr.msra.gmra.mxu1 %v857_v17 }
 0x5ed   : > { %1683 = vmatprep.mubr.msk.bf16.mxu1 %vm2123_vm0, %v2122_v2 }
 0x5ee   : > { %1698 = vmatpush3.bf16.msra.mxu0 %v1854_v60 }
 0x5ef   : > { %1699 = vmatprep.subr.bf16.mxu0 %v2122_v2 }
 0x5f2   : > { %1700 = vmatpush3.bf16.msra.mxu0 %v1855_v61 }
 0x5f3   : > { %1701 = vmatprep.subr.bf16.mxu0 %v2122_v2 }
 0x5f6   : > { %1702 = vmatpush3.bf16.msra.mxu0 %v1856_v62 }
 0x5f7   : > { %1703 = vmatprep.subr.bf16.mxu0 %v2122_v2 }
 0x5fa   : > { %1704 = vmatpush3.bf16.msra.mxu0 %v1857_v63 }
 0x5fb   : > { %1705 = vmatprep.subr.bf16.mxu0 %v2122_v2 }
 0x5fe   : > { %1706 = vmatpush3.bf16.msra.mxu0 %v1858_v0 }
 0x5ff   : > { %1707 = vmatprep.subr.bf16.mxu0 %v2122_v2 }
 0x6a5   : > { %v1012_v19 = vpop.f32.mrf.mxu0 }
 0x6a6   : > { %v1013_v20 = vadd.f32 %v1012_v19, %v976_v18 }
 0x6a7   : > { %v1679_v21 = vpop.f32.mrf.mxu0 }
 0x6a8   : > { %v1019_v22 = vpack.c.bf16 %v1013_v20, %v1013_v20 }
 0x6a9   : > { %v1015_v23 = vpop.f32.mrf.mxu0 }
 0x6aa   : > { %v1031_v24 = vsel %vm720_vm1, %v1019_v22, 0 }
 0x6ab   : > { %v1680_v25 = vpop.f32.mrf.mxu0  ;;  %1682 = vmatpush3.bf16.xpose.msra.mxu1 %v1031_v24 }
 0x6ac   : > { %v944_v26 = vpop.f32.mrf.mxu1  ;;  %1687 = vmatprep.subr.bf16.mxu1 %v2122_v2 }
 0x6ad   : > { %v945_v27 = vadd.f32 %v1534_v1, %v944_v26  ;;  %v1859_v1 = vld [vmem:[%s2406_s3] sm:$0xff]  }
 0x6ae   : > { %v1659_v28 = vpop.f32.mrf.mxu1  ;;  %1708 = vmatpush3.bf16.msra.mxu0 %v1859_v1 }
 0x6af   : > { %v1018_v29 = vpack.c.bf16 %v945_v27, %v945_v27  ;;  %v1557_v28 = vld [vmem:[%s2443_s4 + $0x4] ss:$0 sm:$0xff] }
 0x6b0   : > { %v947_v30 = vpop.f32.mrf.mxu1 }
 0x6b1   : > { %v1558_v30 = vld [vmem:[%s2443_s4 + $0x5] ss:$0 sm:$0xff] }
 0x6b2   : > { %v1660_v31 = vpop.f32.mrf.mxu1  ;;  %1684 = vmatmul.mubr.msk.bf16.vlgmr.msra.gmra.mxu1 %vm720_vm1, %v1018_v29 }
 0x6b3   : > { %1689 = vmatprep.mubr.msk.bf16.mxu1 %vm2123_vm0, %v2122_v2  ;;  %1688 = vmatpush3.bf16.msra.mxu1 %v1089_v44 }
 0x772   : > { %v1067_v33 = vpop.f32.mrf.mxu1 }
 0x773   : > { %v1068_v34 = vadd.f32 %v1543_v32, %v1067_v33 }
 0x774   : > { %v1685_v35 = vpop.f32.mrf.mxu1 }
 0x775   : > { %v1073_v36 = vsel %vm775_vm3, %v1068_v34, -inf }
 0x776   : > { %1074 = vmax.xlane.f32.xlu1 %v1073_v36  ;;  %v1070_v37 = vpop.f32.mrf.mxu1 }
 0x778   : > { %v1686_v38 = vpop.f32.mrf.mxu1 }
 0x7ff   : > { %v1075_v39 = vpop.xlane.xlu1 %1074 }
 0x800   : > { %v1076_v40 = vsub.f32 %v1068_v34, %v1075_v39 }
 0x802   : > { %v1077_v41 = vmul.f32 1.442695, %v1076_v40 }
 0x804   : > { %1866 = vpow2.f32 %v1077_v41 }
 0x811   : > { %v1867_v42 = vpop.eup %1866 }
 0x812   : > { %v1079_v43 = vsel %vm775_vm3, %v1867_v42, 0.0 }
 0x813   : > { %1080 = vadd.xlane.f32.xlu0 %v1079_v43 }
 0x89c   : > { %v1081_v45 = vpop.xlane.xlu0 %1080 }
 0x89d   : > { %1868 = vrcp.f32 %v1081_v45 }
 0x8aa   : > { %v1869_v46 = vpop.eup %1868 }
 0x8ab   : > { %v1083_v47 = vmul.f32 %v1869_v46, %v1867_v42 }
 0x8ad   : > { %v1084_v48 = vpack.c.bf16 %v1083_v47, %v1083_v47 }
 0x8af   : > { %1690 = vmatmul.mubr.msk.bf16.vlgmr.msra.gmra.mxu1 %vm775_vm3, %v1084_v48 }
 0x96f   : > { %v1125_v49 = vpop.f32.mrf.mxu1 }
 0x970   : > { %v1126_v50 = vadd.f32 %v1125_v49, %v856_v16 }
 0x971   : > { %v1691_v51 = vpop.f32.mrf.mxu1 }
 0x972   : > { %1131 = vadd.xlane.f32.xlu0 %v1126_v50 }
 0x973   : > { %v1128_v52 = vpop.f32.mrf.mxu1 }
 0x975   : > { %v1692_v53 = vpop.f32.mrf.mxu1 }
 0x9fb   : > { %v1132_v56 = vpop.xlane.xlu0 %1131 }
 0x9fc   : > { %v1133_v57 = vmul.f32 0.0078125, %v1132_v56 }
 0x9fe   : > { %v1134_v58 = vsub.f32 %v1126_v50, %v1133_v57 }
 0xa00   : > { %v1135_v59 = vmul.f32 %v1134_v58, %v1134_v58 }
 0xa02   : > { %1136 = vadd.xlane.f32.xlu1 %v1135_v59 }
 0xa8b   : > { %v1137_v3 = vpop.xlane.xlu1 %1136 }
 0xa8c   : > { %v1138_v4 = vmul.f32 0.0078125, %v1137_v3 }
 0xa8e   : > { %v1139_v5 = vadd.f32 1e-05, %v1138_v4 }
 0xa90   : > { %1870 = vrsqrt.f32 %v1139_v5 }
 0xa9d   : > { %v1871_v6 = vpop.eup %1870 }
 0xa9e   : > { %v1141_v8 = vmul.f32 %v1871_v6, %v1134_v58 }
 0xaa0   : > { %v1146_v10 = vmul.f32 %v1546_v7, %v1141_v8 }
 0xaa2   : > { %v1151_v11 = vadd.f32 %v1547_v9, %v1146_v10 }
 0xaa4   : > { %v1152_v12 = vpack.c.bf16 %v1151_v11, %v1151_v11 }
 0xaa6   : > { %1710 = vmatmul.mubr.bf16.vlgmr.msra.gmra.mxu0 %v1152_v12 }
 0xb66   : > { %v1241_v14 = vpop.f32.mrf.mxu0 }
 0xb67   : > { %v1242_v15 = vadd.f32 %v1548_v13, %v1241_v14 }
 0xb68   : > { %v1711_v16 = vpop.f32.mrf.mxu0 }
 0xb69   : > { %v1247_v2 = vmax.f32 %v1242_v15, 0.0 }
 0xb6a   : > { %v1244_v17 = vpop.f32.mrf.mxu0 }
 0xb6b   : > { %v1248_v18 = vadd.f32 %v1247_v2, %v1151_v11 }
 0xb6c   : > { %v1712_v19 = vpop.f32.mrf.mxu0 }
 0xb6d   : > { %1249 = vadd.xlane.f32.xlu0 %v1248_v18 }
 0xbf6   : > { %v1250_v20 = vpop.xlane.xlu0 %1249 }
 0xbf7   : > { %v1251_v21 = vmul.f32 0.0078125, %v1250_v20 }
 0xbf9   : > { %v1252_v22 = vsub.f32 %v1248_v18, %v1251_v21 }
 0xbfb   : > { %v1253_v23 = vmul.f32 %v1252_v22, %v1252_v22 }
 0xbfd   : > { %1254 = vadd.xlane.f32.xlu1 %v1253_v23 }
 0xc86   : > { %v1255_v24 = vpop.xlane.xlu1 %1254 }
 0xc87   : > { %v1256_v25 = vmul.f32 0.0078125, %v1255_v24 }
 0xc89   : > { %v1257_v26 = vadd.f32 1e-05, %v1256_v25 }
 0xc8b   : > { %1872 = vrsqrt.f32 %v1257_v26 }
 0xc98   : > { %v1873_v27 = vpop.eup %1872 }
 0xc99   : > { %v1259_v29 = vmul.f32 %v1873_v27, %v1252_v22 }
 0xc9b   : > { %v1264_v31 = vmul.f32 %v1557_v28, %v1259_v29 }
 0xc9d   : > { %v1269_v32 = vadd.f32 %v1558_v30, %v1264_v31 }
 0xc9f   : > { %1270 = vst [vmem:[%s2445_s27] sm:$0xff] %v1269_v32 }
 0xca0   : > { %1999 = shalt.err (!%p1996_p9)
}
 0xca1   : > { %s2000_s16 = scalar_lea.hbm %s1283_s12, 128  ;;  %s2004_s14 = scalar_lea.hbm %s2704_s24, 256 }
 0xca2   : > { %p2001_p0 = scmp.ne.s32.totalorder %s1283_s12, %s2000_s16  ;;  %p2005_p4 = scmp.lt.s32.totalorder %s1283_s12, %s2704_s24 }
 0xca3   : > { %p2006_p3 = scmp.lt.s32.totalorder %s2004_s14, %s2000_s16 }
 0xca4   : > { %p2002_p13 = pnand %p2001_p0, %p2705_p8 }
 0xca5   : > { %p2007_p6 = por %p2006_p3, %p2005_p4 }
 0xca6   : > { %p2003_p1 = pneg %p2002_p13 }
 0xca8   : > { %p2008_p12 = pnand %p2007_p6, %p2003_p1 }
 0xcaa   : > { %2011 = shalt.err (!%p2008_p12)
}
 0xcab   : > { %1721 = dma.vmem_to_hbm [thread:$0]  (%p2705_p8), %s1286_s2, 128, %s1283_s12, %s1272_s23  }
 0xcac PF: > { %s2706_s26 = sld [smem:[#allocation22_spill]] }
 0xcad   : > { %s2707_s8 = sld [smem:[#allocation17_spill]] }
 0xcae   : > { %s2708_s29 = sld [smem:[#allocation28_spill]] }
 0xcb2   : > { %p1741_p7 = scmp.ge.s32.totalorder %s2706_s26, 2 }
 0xcb3   : > { %s1297_s0 = sand.u32 1, %s2707_s8  }
 0xcb4   : > { %p2709_p11 = scmp.ne.s32.totalorder %s2708_s29, 0  ;;  %s1298_s4 = scalar_lea.sflag [#allocation4], %s1297_s0 }
 0xcb6   : > { %p1737_p5 = pnand %p1741_p7, %p2709_p11 }
 0xcb8   : > { %p1738_p10 = pneg %p1737_p5 }
 0xcba   : > { %2069 = dma.done.wait (%p1738_p10), %s1298_s4, 128  }
 0xcbb   : > { %2071 = vsyncadd (%p1738_p10), %s1298_s4, 4294967168  ;;  %s31_s19 = sadd.s32 1, %s2706_s26   ;;  %s2710_s30 = sld [smem:[#allocation15_spill]] }
 0xcbc   : > { %p28_p2 = scmp.ge.s32.totalorder %s31_s19, 6   ;;  %s2711_s10 = sld [smem:[#allocation16_spill]] }
 0xcbd   : > { %s2712_s11 = sld [smem:[#allocation25_spill]] }
 0xcbe   : > { %s2713_s12 = sld [smem:[#allocation18_spill]] }
 0xcbf   : > { %s2714_s13 = sld [smem:[#allocation19_spill]] }
 0xcc0   : > { %s2715_s14 = sld [smem:[#allocation26_spill]]  ;;  %30 = sbr.rel (!%p28_p2) target bundleno = 24 (0x18), region = 158 }
 0xcc1   : > { %s2716_s15 = sld [smem:[#allocation20_spill]] }
 0xcc2   : > { %s2717_s16 = sld [smem:[#allocation21_spill]] }
 0xcc3   : > { %s2718_s17 = sld [smem:[#allocation23_spill]] }
 0xcc4   : > { %s2719_s18 = sld [smem:[#allocation24_spill]] }
 0xcc5   :  { %1303 = vsyncpa [#allocation3], 1 }
 0xcc6   :  { %1305 = vsyncpa [#allocation3 + $0x1], 1 }
 0xcc7   :  { %1306 = vsyncpa [#allocation6], 1 }
 0xcc8   :  { %1308 = vsyncpa [#allocation6 + $0x1], 1 }
 0xcc9   :  { %1309 = vsyncpa [#allocation9], 1 }
 0xcca   :  { %1311 = vsyncpa [#allocation9 + $0x1], 1 }
 0xccb   :  { %1312 = vsyncpa [#allocation4], 1 }
 0xccc   :  { %1314 = vsyncpa [#allocation4 + $0x1], 1 }

</bundles_post_ra>
